<compile_context>
chip_gen: v7x
topology: tpu7x:2x2x1
jax: 0.10.0
libtpu: 0.0.40
codegen_flags: <defaults>
</compile_context>

<pallas_src>
import jax
import jax.numpy as jnp
from jax.experimental import pallas as pl
from jax.experimental.pallas import tpu as pltpu


# ----------------------------------------------------------------------------
# Pallas kernels
# ----------------------------------------------------------------------------
def _conv_relu_pool_kernel(p00_ref, p01_ref, p10_ref, p11_ref, w_ref, b_ref, o_ref):
    """Fused 3x3 conv (as matmul) + bias + ReLU + 2x2 max-pool.

    p??: (9*Cin, M) bf16 patch matrices, one per 2x2-pool-window parity.
    w  : (Cout, 9*Cin) bf16.   b: (Cout, 1) f32.   o: (Cout, M) bf16.
    """
    w = w_ref[...]

    def mm(p_ref):
        return jnp.dot(w, p_ref[...], preferred_element_type=jnp.float32)

    m = jnp.maximum(jnp.maximum(mm(p00_ref), mm(p01_ref)),
                    jnp.maximum(mm(p10_ref), mm(p11_ref)))
    o_ref[...] = jnp.maximum(m + b_ref[...], 0.0).astype(o_ref.dtype)


def _fc_head_kernel(x_ref, w1_ref, b1_ref, w2_ref, b2_ref, o_ref):
    """o = w2 @ relu(w1 @ x + b1) + b2 on (features, batch)-major tiles."""
    h = jnp.dot(w1_ref[...], x_ref[...], preferred_element_type=jnp.float32)
    h = jnp.maximum(h + b1_ref[...], 0.0).astype(jnp.bfloat16)
    o = jnp.dot(w2_ref[...], h, preferred_element_type=jnp.float32)
    o_ref[...] = o + b2_ref[...]


# ----------------------------------------------------------------------------
# Wrappers
# ----------------------------------------------------------------------------
def conv3x3_relu_pool(x_chwn, w_cf, b_col, *, lane_tile=512):
    """PyTorch Conv2d(k=3, pad=1) + ReLU + MaxPool2d(2) on a CHWN activation.

    x_chwn: (Cin, H, W, B) bf16.  w_cf: (Cout, 9*Cin) bf16 with columns ordered
    (ky, kx, ci).  b_col: (Cout, 1) f32.  Returns (Cout, H//2, W//2, B) bf16.
    """
    Cin, H, W, B = x_chwn.shape
    Cout = w_cf.shape[0]
    assert H % 2 == 0 and W % 2 == 0
    Hh, Wh = H // 2, W // 2
    M = Hh * Wh * B
    K = 9 * Cin

    xp = jnp.pad(x_chwn, ((0, 0), (1, 1), (1, 1), (0, 0)))

    def parity_patches(dy, dx):
        # rows ordered (ky, kx, ci); columns ordered (i, j, b)
        views = []
        for ky in range(3):
            for kx in range(3):
                v = xp[:, dy + ky: dy + ky + 2 * Hh: 2,
                       dx + kx: dx + kx + 2 * Wh: 2, :]       # (Cin, Hh, Wh, B)
                views.append(v.reshape(Cin, M))
        return jnp.concatenate(views, axis=0)                 # (K, M)

    patches = [parity_patches(dy, dx) for dy in (0, 1) for dx in (0, 1)]

    tm = M if M <= lane_tile else lane_tile                   # lane tile (mult. of 128 when tiled)
    grid = (pl.cdiv(M, tm),)
    out = pl.pallas_call(
        _conv_relu_pool_kernel,
        out_shape=jax.ShapeDtypeStruct((Cout, M), jnp.bfloat16),
        grid=grid,
        in_specs=[pl.BlockSpec((K, tm), lambda i: (0, i)) for _ in range(4)]
        + [pl.BlockSpec((Cout, K), lambda i: (0, 0)),
           pl.BlockSpec((Cout, 1), lambda i: (0, 0))],
        out_specs=pl.BlockSpec((Cout, tm), lambda i: (0, i)),
        compiler_params=pltpu.CompilerParams(dimension_semantics=("parallel",)),
    )(*patches, w_cf, b_col)
    return out.reshape(Cout, Hh, Wh, B)


def fc_head(x_fb, w1, b1, w2, b2, *, lane_tile=512):
    """Fused fc1+ReLU+fc2.  x_fb: (F, B) bf16 (rows in torch (c,h,w) order).
    Returns logits transposed: (N2, B) f32."""
    F, B = x_fb.shape
    N1 = w1.shape[0]
    N2 = w2.shape[0]
    tb = B if B <= lane_tile else lane_tile
    grid = (pl.cdiv(B, tb),)
    return pl.pallas_call(
        _fc_head_kernel,
        out_shape=jax.ShapeDtypeStruct((N2, B), jnp.float32),
        grid=grid,
        in_specs=[pl.BlockSpec((F, tb), lambda i: (0, i)),
                  pl.BlockSpec((N1, F), lambda i: (0, 0)),
                  pl.BlockSpec((N1, 1), lambda i: (0, 0)),
                  pl.BlockSpec((N2, N1), lambda i: (0, 0)),
                  pl.BlockSpec((N2, 1), lambda i: (0, 0))],
        out_specs=pl.BlockSpec((N2, tb), lambda i: (0, i)),
        compiler_params=pltpu.CompilerParams(dimension_semantics=("parallel",)),
    )(x_fb, w1, b1, w2, b2)


# ----------------------------------------------------------------------------
# Full CNN forward (PyTorch-equivalent semantics)
# ----------------------------------------------------------------------------
def cnn_forward(x_nchw, params):
    bf16, f32 = jnp.bfloat16, jnp.float32
    B = x_nchw.shape[0]

    # Trace-time weight repacking (constant-folded under jit); bf16 MXU operands.
    # conv weights -> (Cout, ky*kx*Cin) to match the patch-row order.
    w1 = params["conv1_w"].transpose(0, 2, 3, 1).reshape(16, 9).astype(bf16)
    b1 = params["conv1_b"].reshape(16, 1).astype(f32)
    w2 = params["conv2_w"].transpose(0, 2, 3, 1).reshape(32, 9 * 16).astype(bf16)
    b2 = params["conv2_b"].reshape(32, 1).astype(f32)
    fw1 = params["fc1_w"].astype(bf16)                 # (128, 32*7*7), cols already (c,h,w)
    fb1 = params["fc1_b"].reshape(128, 1).astype(f32)
    fw2 = params["fc2_w"].astype(bf16)                 # (10, 128)
    fb2 = params["fc2_b"].reshape(10, 1).astype(f32)

    # NCHW -> CHWN (channels-first, batch-minor): conv matmul lane dim = H*W*B.
    x = jnp.transpose(x_nchw, (1, 2, 3, 0)).astype(bf16)      # (1, 28, 28, B)

    a1 = conv3x3_relu_pool(x, w1, b1)                          # (16, 14, 14, B)
    a2 = conv3x3_relu_pool(a1, w2, b2)                         # (32,  7,  7, B)

    feat = a2.reshape(32 * 7 * 7, B)                           # free reshape, rows = (c,h,w)
    logits_t = fc_head(feat, fw1, fb1, fw2, fb2)               # (10, B) f32
    return logits_t.T                                          # (B, 10)


def init_params(key):
    ks = jax.random.split(key, 8)
    s = 0.05
    return {
        "conv1_w": s * jax.random.normal(ks[0], (16, 1, 3, 3), jnp.float32),
        "conv1_b": s * jax.random.normal(ks[1], (16,), jnp.float32),
        "conv2_w": s * jax.random.normal(ks[2], (32, 16, 3, 3), jnp.float32),
        "conv2_b": s * jax.random.normal(ks[3], (32,), jnp.float32),
        "fc1_w": s * jax.random.normal(ks[4], (128, 32 * 7 * 7), jnp.float32),
        "fc1_b": s * jax.random.normal(ks[5], (128,), jnp.float32),
        "fc2_w": s * jax.random.normal(ks[6], (10, 128), jnp.float32),
        "fc2_b": s * jax.random.normal(ks[7], (10,), jnp.float32),
    }


if __name__ == "__main__":
    key = jax.random.PRNGKey(0)
    pkey, xkey = jax.random.split(key)
    params = init_params(pkey)
    # Spatial size 28 is implied by fc1's 32*7*7 input (two 2x2 pools: 28->14->7).
    x = jax.random.normal(xkey, (2, 1, 28, 28), jnp.float32)

    out = jax.jit(cnn_forward)(x, params)
    out = jax.block_until_ready(out)
    assert out.shape == (2, 10) and out.dtype == jnp.float32
    print("KERNEL_OK")
</pallas_src>

<mosaic_0001>
module attributes {stable_mosaic.version = 11 : i64} {
  func.func @_conv_relu_pool_kernel(%arg0: i32, %arg1: memref<9x392xbf16, #tpu.memory_space<vmem>>, %arg2: memref<9x392xbf16, #tpu.memory_space<vmem>>, %arg3: memref<9x392xbf16, #tpu.memory_space<vmem>>, %arg4: memref<9x392xbf16, #tpu.memory_space<vmem>>, %arg5: memref<16x9xbf16, #tpu.memory_space<vmem>>, %arg6: memref<16x1xf32, #tpu.memory_space<vmem>>, %arg7: memref<16x392xbf16, #tpu.memory_space<vmem>>) attributes {dimension_semantics = [#tpu.dimension_semantics<parallel>], iteration_bounds = array<i64: 1>, scalar_prefetch = 0 : i64, scratch_operands = 0 : i64, tpu.core_type = #tpu.core_type<tc>, window_params = [{transform_indices = @transform_0, window_bounds = array<i64: 9, 392>}, {transform_indices = @transform_1, window_bounds = array<i64: 9, 392>}, {transform_indices = @transform_2, window_bounds = array<i64: 9, 392>}, {transform_indices = @transform_3, window_bounds = array<i64: 9, 392>}, {pipeline_mode = #tpu.pipeline_mode<synchronous>, transform_indices = @transform_4, window_bounds = array<i64: 16, 9>}, {pipeline_mode = #tpu.pipeline_mode<synchronous>, transform_indices = @transform_5, window_bounds = array<i64: 16, 1>}, {transform_indices = @transform_6, window_bounds = array<i64: 16, 392>}]} {
    %c0 = arith.constant 0 : index
    %c0_0 = arith.constant 0 : index
    %0 = vector.load %arg5[%c0, %c0_0] : memref<16x9xbf16, #tpu.memory_space<vmem>>, vector<16x9xbf16>
    %c0_1 = arith.constant 0 : index
    %c0_2 = arith.constant 0 : index
    %1 = vector.load %arg1[%c0_1, %c0_2] : memref<9x392xbf16, #tpu.memory_space<vmem>>, vector<9x392xbf16>
    %cst = arith.constant dense<0.000000e+00> : vector<16x392xf32>
    %2 = tpu.matmul %0, %1, %cst {dimension_numbers = #tpu.dot_dimension_numbers<[1], [0], [0], [1], [0, 0, 1, 1], [], []>} : vector<16x9xbf16>, vector<9x392xbf16>, vector<16x392xf32> -> vector<16x392xf32>
    %c0_3 = arith.constant 0 : index
    %c0_4 = arith.constant 0 : index
    %3 = vector.load %arg2[%c0_3, %c0_4] : memref<9x392xbf16, #tpu.memory_space<vmem>>, vector<9x392xbf16>
    %cst_5 = arith.constant dense<0.000000e+00> : vector<16x392xf32>
    %4 = tpu.matmul %0, %3, %cst_5 {dimension_numbers = #tpu.dot_dimension_numbers<[1], [0], [0], [1], [0, 0, 1, 1], [], []>} : vector<16x9xbf16>, vector<9x392xbf16>, vector<16x392xf32> -> vector<16x392xf32>
    %5 = arith.maximumf %2, %4 : vector<16x392xf32>
    %c0_6 = arith.constant 0 : index
    %c0_7 = arith.constant 0 : index
    %6 = vector.load %arg3[%c0_6, %c0_7] : memref<9x392xbf16, #tpu.memory_space<vmem>>, vector<9x392xbf16>
    %cst_8 = arith.constant dense<0.000000e+00> : vector<16x392xf32>
    %7 = tpu.matmul %0, %6, %cst_8 {dimension_numbers = #tpu.dot_dimension_numbers<[1], [0], [0], [1], [0, 0, 1, 1], [], []>} : vector<16x9xbf16>, vector<9x392xbf16>, vector<16x392xf32> -> vector<16x392xf32>
    %c0_9 = arith.constant 0 : index
    %c0_10 = arith.constant 0 : index
    %8 = vector.load %arg4[%c0_9, %c0_10] : memref<9x392xbf16, #tpu.memory_space<vmem>>, vector<9x392xbf16>
    %cst_11 = arith.constant dense<0.000000e+00> : vector<16x392xf32>
    %9 = tpu.matmul %0, %8, %cst_11 {dimension_numbers = #tpu.dot_dimension_numbers<[1], [0], [0], [1], [0, 0, 1, 1], [], []>} : vector<16x9xbf16>, vector<9x392xbf16>, vector<16x392xf32> -> vector<16x392xf32>
    %10 = arith.maximumf %7, %9 : vector<16x392xf32>
    %11 = arith.maximumf %5, %10 : vector<16x392xf32>
    %c0_12 = arith.constant 0 : index
    %c0_13 = arith.constant 0 : index
    %12 = vector.load %arg6[%c0_12, %c0_13] : memref<16x1xf32, #tpu.memory_space<vmem>>, vector<16x1xf32>
    %13 = vector.broadcast %12 : vector<16x1xf32> to vector<16x392xf32>
    %14 = arith.addf %11, %13 : vector<16x392xf32>
    %cst_14 = arith.constant 0.000000e+00 : f32
    %15 = vector.broadcast %cst_14 : f32 to vector<16x392xf32>
    %16 = arith.maximumf %14, %15 : vector<16x392xf32>
    %17 = arith.truncf %16 : vector<16x392xf32> to vector<16x392xbf16>
    %c0_15 = arith.constant 0 : index
    %c0_16 = arith.constant 0 : index
    %18 = vector.load %arg7[%c0_15, %c0_16] : memref<16x392xbf16, #tpu.memory_space<vmem>>, vector<16x392xbf16>
    tpu.vector_store %arg7[%c0_15, %c0_16], %17 {strides = array<i32>} : memref<16x392xbf16, #tpu.memory_space<vmem>>, vector<16x392xbf16>,
    return
  }
  func.func @transform_0(%arg0: i32) -> (i32, i32) {
    %c0_i32 = arith.constant 0 : i32
    %c0_i32_0 = arith.constant 0 : i32
    return %c0_i32, %arg0 : i32, i32
  }
  func.func @transform_1(%arg0: i32) -> (i32, i32) {
    %c0_i32 = arith.constant 0 : i32
    %c0_i32_0 = arith.constant 0 : i32
    return %c0_i32, %arg0 : i32, i32
  }
  func.func @transform_2(%arg0: i32) -> (i32, i32) {
    %c0_i32 = arith.constant 0 : i32
    %c0_i32_0 = arith.constant 0 : i32
    return %c0_i32, %arg0 : i32, i32
  }
  func.func @transform_3(%arg0: i32) -> (i32, i32) {
    %c0_i32 = arith.constant 0 : i32
    %c0_i32_0 = arith.constant 0 : i32
    return %c0_i32, %arg0 : i32, i32
  }
  func.func @transform_4(%arg0: i32) -> (i32, i32) {
    %c0_i32 = arith.constant 0 : i32
    %c0_i32_0 = arith.constant 0 : i32
    %c0_i32_1 = arith.constant 0 : i32
    return %c0_i32, %c0_i32_0 : i32, i32
  }
  func.func @transform_5(%arg0: i32) -> (i32, i32) {
    %c0_i32 = arith.constant 0 : i32
    %c0_i32_0 = arith.constant 0 : i32
    %c0_i32_1 = arith.constant 0 : i32
    return %c0_i32, %c0_i32_0 : i32, i32
  }
  func.func @transform_6(%arg0: i32) -> (i32, i32) {
    %c0_i32 = arith.constant 0 : i32
    %c0_i32_0 = arith.constant 0 : i32
    return %c0_i32, %arg0 : i32, i32
  }
}

module attributes {stable_mosaic.version = 11 : i64} {
  func.func @_conv_relu_pool_kernel(%arg0: i32, %arg1: memref<144x98xbf16, #tpu.memory_space<vmem>>, %arg2: memref<144x98xbf16, #tpu.memory_space<vmem>>, %arg3: memref<144x98xbf16, #tpu.memory_space<vmem>>, %arg4: memref<144x98xbf16, #tpu.memory_space<vmem>>, %arg5: memref<32x144xbf16, #tpu.memory_space<vmem>>, %arg6: memref<32x1xf32, #tpu.memory_space<vmem>>, %arg7: memref<32x98xbf16, #tpu.memory_space<vmem>>) attributes {dimension_semantics = [#tpu.dimension_semantics<parallel>], iteration_bounds = array<i64: 1>, scalar_prefetch = 0 : i64, scratch_operands = 0 : i64, tpu.core_type = #tpu.core_type<tc>, window_params = [{transform_indices = @transform_0, window_bounds = array<i64: 144, 98>}, {transform_indices = @transform_1, window_bounds = array<i64: 144, 98>}, {transform_indices = @transform_2, window_bounds = array<i64: 144, 98>}, {transform_indices = @transform_3, window_bounds = array<i64: 144, 98>}, {pipeline_mode = #tpu.pipeline_mode<synchronous>, transform_indices = @transform_4, window_bounds = array<i64: 32, 144>}, {pipeline_mode = #tpu.pipeline_mode<synchronous>, transform_indices = @transform_5, window_bounds = array<i64: 32, 1>}, {transform_indices = @transform_6, window_bounds = array<i64: 32, 98>}]} {
    %c0 = arith.constant 0 : index
    %c0_0 = arith.constant 0 : index
    %0 = vector.load %arg5[%c0, %c0_0] : memref<32x144xbf16, #tpu.memory_space<vmem>>, vector<32x144xbf16>
    %c0_1 = arith.constant 0 : index
    %c0_2 = arith.constant 0 : index
    %1 = vector.load %arg1[%c0_1, %c0_2] : memref<144x98xbf16, #tpu.memory_space<vmem>>, vector<144x98xbf16>
    %cst = arith.constant dense<0.000000e+00> : vector<32x98xf32>
    %2 = tpu.matmul %0, %1, %cst {dimension_numbers = #tpu.dot_dimension_numbers<[1], [0], [0], [1], [0, 0, 1, 1], [], []>} : vector<32x144xbf16>, vector<144x98xbf16>, vector<32x98xf32> -> vector<32x98xf32>
    %c0_3 = arith.constant 0 : index
    %c0_4 = arith.constant 0 : index
    %3 = vector.load %arg2[%c0_3, %c0_4] : memref<144x98xbf16, #tpu.memory_space<vmem>>, vector<144x98xbf16>
    %cst_5 = arith.constant dense<0.000000e+00> : vector<32x98xf32>
    %4 = tpu.matmul %0, %3, %cst_5 {dimension_numbers = #tpu.dot_dimension_numbers<[1], [0], [0], [1], [0, 0, 1, 1], [], []>} : vector<32x144xbf16>, vector<144x98xbf16>, vector<32x98xf32> -> vector<32x98xf32>
    %5 = arith.maximumf %2, %4 : vector<32x98xf32>
    %c0_6 = arith.constant 0 : index
    %c0_7 = arith.constant 0 : index
    %6 = vector.load %arg3[%c0_6, %c0_7] : memref<144x98xbf16, #tpu.memory_space<vmem>>, vector<144x98xbf16>
    %cst_8 = arith.constant dense<0.000000e+00> : vector<32x98xf32>
    %7 = tpu.matmul %0, %6, %cst_8 {dimension_numbers = #tpu.dot_dimension_numbers<[1], [0], [0], [1], [0, 0, 1, 1], [], []>} : vector<32x144xbf16>, vector<144x98xbf16>, vector<32x98xf32> -> vector<32x98xf32>
    %c0_9 = arith.constant 0 : index
    %c0_10 = arith.constant 0 : index
    %8 = vector.load %arg4[%c0_9, %c0_10] : memref<144x98xbf16, #tpu.memory_space<vmem>>, vector<144x98xbf16>
    %cst_11 = arith.constant dense<0.000000e+00> : vector<32x98xf32>
    %9 = tpu.matmul %0, %8, %cst_11 {dimension_numbers = #tpu.dot_dimension_numbers<[1], [0], [0], [1], [0, 0, 1, 1], [], []>} : vector<32x144xbf16>, vector<144x98xbf16>, vector<32x98xf32> -> vector<32x98xf32>
    %10 = arith.maximumf %7, %9 : vector<32x98xf32>
    %11 = arith.maximumf %5, %10 : vector<32x98xf32>
    %c0_12 = arith.constant 0 : index
    %c0_13 = arith.constant 0 : index
    %12 = vector.load %arg6[%c0_12, %c0_13] : memref<32x1xf32, #tpu.memory_space<vmem>>, vector<32x1xf32>
    %13 = vector.broadcast %12 : vector<32x1xf32> to vector<32x98xf32>
    %14 = arith.addf %11, %13 : vector<32x98xf32>
    %cst_14 = arith.constant 0.000000e+00 : f32
    %15 = vector.broadcast %cst_14 : f32 to vector<32x98xf32>
    %16 = arith.maximumf %14, %15 : vector<32x98xf32>
    %17 = arith.truncf %16 : vector<32x98xf32> to vector<32x98xbf16>
    %c0_15 = arith.constant 0 : index
    %c0_16 = arith.constant 0 : index
    %18 = vector.load %arg7[%c0_15, %c0_16] : memref<32x98xbf16, #tpu.memory_space<vmem>>, vector<32x98xbf16>
    tpu.vector_store %arg7[%c0_15, %c0_16], %17 {strides = array<i32>} : memref<32x98xbf16, #tpu.memory_space<vmem>>, vector<32x98xbf16>,
    return
  }
  func.func @transform_0(%arg0: i32) -> (i32, i32) {
    %c0_i32 = arith.constant 0 : i32
    %c0_i32_0 = arith.constant 0 : i32
    return %c0_i32, %arg0 : i32, i32
  }
  func.func @transform_1(%arg0: i32) -> (i32, i32) {
    %c0_i32 = arith.constant 0 : i32
    %c0_i32_0 = arith.constant 0 : i32
    return %c0_i32, %arg0 : i32, i32
  }
  func.func @transform_2(%arg0: i32) -> (i32, i32) {
    %c0_i32 = arith.constant 0 : i32
    %c0_i32_0 = arith.constant 0 : i32
    return %c0_i32, %arg0 : i32, i32
  }
  func.func @transform_3(%arg0: i32) -> (i32, i32) {
    %c0_i32 = arith.constant 0 : i32
    %c0_i32_0 = arith.constant 0 : i32
    return %c0_i32, %arg0 : i32, i32
  }
  func.func @transform_4(%arg0: i32) -> (i32, i32) {
    %c0_i32 = arith.constant 0 : i32
    %c0_i32_0 = arith.constant 0 : i32
    %c0_i32_1 = arith.constant 0 : i32
    return %c0_i32, %c0_i32_0 : i32, i32
  }
  func.func @transform_5(%arg0: i32) -> (i32, i32) {
    %c0_i32 = arith.constant 0 : i32
    %c0_i32_0 = arith.constant 0 : i32
    %c0_i32_1 = arith.constant 0 : i32
    return %c0_i32, %c0_i32_0 : i32, i32
  }
  func.func @transform_6(%arg0: i32) -> (i32, i32) {
    %c0_i32 = arith.constant 0 : i32
    %c0_i32_0 = arith.constant 0 : i32
    return %c0_i32, %arg0 : i32, i32
  }
}

module attributes {stable_mosaic.version = 11 : i64} {
  func.func @_fc_head_kernel(%arg0: i32, %arg1: memref<1568x2xbf16, #tpu.memory_space<vmem>>, %arg2: memref<128x1568xbf16, #tpu.memory_space<vmem>>, %arg3: memref<128x1xf32, #tpu.memory_space<vmem>>, %arg4: memref<10x128xbf16, #tpu.memory_space<vmem>>, %arg5: memref<10x1xf32, #tpu.memory_space<vmem>>, %arg6: memref<10x2xf32, #tpu.memory_space<vmem>>) attributes {dimension_semantics = [#tpu.dimension_semantics<parallel>], iteration_bounds = array<i64: 1>, scalar_prefetch = 0 : i64, scratch_operands = 0 : i64, tpu.core_type = #tpu.core_type<tc>, window_params = [{transform_indices = @transform_0, window_bounds = array<i64: 1568, 2>}, {pipeline_mode = #tpu.pipeline_mode<synchronous>, transform_indices = @transform_1, window_bounds = array<i64: 128, 1568>}, {pipeline_mode = #tpu.pipeline_mode<synchronous>, transform_indices = @transform_2, window_bounds = array<i64: 128, 1>}, {pipeline_mode = #tpu.pipeline_mode<synchronous>, transform_indices = @transform_3, window_bounds = array<i64: 10, 128>}, {pipeline_mode = #tpu.pipeline_mode<synchronous>, transform_indices = @transform_4, window_bounds = array<i64: 10, 1>}, {transform_indices = @transform_5, window_bounds = array<i64: 10, 2>}]} {
    %c0 = arith.constant 0 : index
    %c0_0 = arith.constant 0 : index
    %0 = vector.load %arg2[%c0, %c0_0] : memref<128x1568xbf16, #tpu.memory_space<vmem>>, vector<128x1568xbf16>
    %c0_1 = arith.constant 0 : index
    %c0_2 = arith.constant 0 : index
    %1 = vector.load %arg1[%c0_1, %c0_2] : memref<1568x2xbf16, #tpu.memory_space<vmem>>, vector<1568x2xbf16>
    %cst = arith.constant dense<0.000000e+00> : vector<128x2xf32>
    %2 = tpu.matmul %0, %1, %cst {dimension_numbers = #tpu.dot_dimension_numbers<[1], [0], [0], [1], [0, 0, 1, 1], [], []>} : vector<128x1568xbf16>, vector<1568x2xbf16>, vector<128x2xf32> -> vector<128x2xf32>
    %c0_3 = arith.constant 0 : index
    %c0_4 = arith.constant 0 : index
    %3 = vector.load %arg3[%c0_3, %c0_4] : memref<128x1xf32, #tpu.memory_space<vmem>>, vector<128x1xf32>
    %4 = vector.broadcast %3 : vector<128x1xf32> to vector<128x2xf32>
    %5 = arith.addf %2, %4 : vector<128x2xf32>
    %cst_5 = arith.constant 0.000000e+00 : f32
    %6 = vector.broadcast %cst_5 : f32 to vector<128x2xf32>
    %7 = arith.maximumf %5, %6 : vector<128x2xf32>
    %8 = arith.truncf %7 : vector<128x2xf32> to vector<128x2xbf16>
    %c0_6 = arith.constant 0 : index
    %c0_7 = arith.constant 0 : index
    %9 = vector.load %arg4[%c0_6, %c0_7] : memref<10x128xbf16, #tpu.memory_space<vmem>>, vector<10x128xbf16>
    %cst_8 = arith.constant dense<0.000000e+00> : vector<10x2xf32>
    %10 = tpu.matmul %9, %8, %cst_8 {dimension_numbers = #tpu.dot_dimension_numbers<[1], [0], [0], [1], [0, 0, 1, 1], [], []>} : vector<10x128xbf16>, vector<128x2xbf16>, vector<10x2xf32> -> vector<10x2xf32>
    %c0_9 = arith.constant 0 : index
    %c0_10 = arith.constant 0 : index
    %11 = vector.load %arg5[%c0_9, %c0_10] : memref<10x1xf32, #tpu.memory_space<vmem>>, vector<10x1xf32>
    %12 = vector.broadcast %11 : vector<10x1xf32> to vector<10x2xf32>
    %13 = arith.addf %10, %12 : vector<10x2xf32>
    %c0_11 = arith.constant 0 : index
    %c0_12 = arith.constant 0 : index
    %14 = vector.load %arg6[%c0_11, %c0_12] : memref<10x2xf32, #tpu.memory_space<vmem>>, vector<10x2xf32>
    tpu.vector_store %arg6[%c0_11, %c0_12], %13 {strides = array<i32>} : memref<10x2xf32, #tpu.memory_space<vmem>>, vector<10x2xf32>,
    return
  }
  func.func @transform_0(%arg0: i32) -> (i32, i32) {
    %c0_i32 = arith.constant 0 : i32
    %c0_i32_0 = arith.constant 0 : i32
    return %c0_i32, %arg0 : i32, i32
  }
  func.func @transform_1(%arg0: i32) -> (i32, i32) {
    %c0_i32 = arith.constant 0 : i32
    %c0_i32_0 = arith.constant 0 : i32
    %c0_i32_1 = arith.constant 0 : i32
    return %c0_i32, %c0_i32_0 : i32, i32
  }
  func.func @transform_2(%arg0: i32) -> (i32, i32) {
    %c0_i32 = arith.constant 0 : i32
    %c0_i32_0 = arith.constant 0 : i32
    %c0_i32_1 = arith.constant 0 : i32
    return %c0_i32, %c0_i32_0 : i32, i32
  }
  func.func @transform_3(%arg0: i32) -> (i32, i32) {
    %c0_i32 = arith.constant 0 : i32
    %c0_i32_0 = arith.constant 0 : i32
    %c0_i32_1 = arith.constant 0 : i32
    return %c0_i32, %c0_i32_0 : i32, i32
  }
  func.func @transform_4(%arg0: i32) -> (i32, i32) {
    %c0_i32 = arith.constant 0 : i32
    %c0_i32_0 = arith.constant 0 : i32
    %c0_i32_1 = arith.constant 0 : i32
    return %c0_i32, %c0_i32_0 : i32, i32
  }
  func.func @transform_5(%arg0: i32) -> (i32, i32) {
    %c0_i32 = arith.constant 0 : i32
    %c0_i32_0 = arith.constant 0 : i32
    return %c0_i32, %arg0 : i32, i32
  }
}

</mosaic_0001>

<bundles_post_ra>
// kernel: cnn_forward.3
= control target key start
LH: loop header
LB: loop body
LE: loop exit
PB: predicated region body
PF: predicated region fallthrough
CT: control target
= control target key end

     0   :  { %vm55_vm0 = vcmask 1043456   ;;  %vm56_vm1 = vcmask 1044480   ;;  %v658_v1 = vmov 0   ;;  %v659_v2 = vmov 65535   ;;  %s812_s0 = inlined_call_operand.vmem [shape: bf16[9,392], index: 0, kind: input, shape index: {}]   ;;  %s813_s4 = inlined_call_operand.vmem [shape: bf16[16,9], index: 4, kind: input, shape index: {}]   ;;  %s814_s1 = inlined_call_operand.vmem [shape: bf16[9,392], index: 1, kind: input, shape index: {}]   ;;  %s815_s2 = inlined_call_operand.vmem [shape: bf16[9,392], index: 2, kind: input, shape index: {}]   ;;  %s816_s3 = inlined_call_operand.vmem [shape: bf16[9,392], index: 3, kind: input, shape index: {}]   ;;  %s817_s5 = inlined_call_operand.vmem [shape: f32[16,1], index: 5, kind: input, shape index: {}]   ;;  %s818_s6 = inlined_call_operand.vmem [shape: bf16[16,392], index: 6, kind: output, shape index: {}]  }
   0x1   :  { %v633_v0 = vld [vmem:[%s812_s0 + $0x4] ss:$16 sps:$4 sm:$0x1f]   ;;  %103 = vmatprep.mubr.bf16.mxu0 %v658_v1  ;;  %146 = vmatprep.mubr.bf16.mxu1 %v658_v1  ;;  %v57_v3 = vsel %vm55_vm0, 4294967295, %v659_v2  ;;  %vm51_vm2 = vcmask 72704   ;;  %v536_v36 = vld [vmem:[%s817_s5 + $0x8] sm:$0xff] }
   0x2   :  { %632 = vset.pattern.permute.xlu0 %v658_v1  ;;  %v702_v4 = vsel %vm56_vm1, %v57_v3, 0  ;;  %v635_v5 = vld [vmem:[%s812_s0 + $0xc] ss:$16 sps:$4 sm:$0x1f]   ;;  %v718_v10 = vld [vmem:[%s813_s4] sm:$0xff]   ;;  %vm588_vm3 = vcmask 64516  }
   0x3   :  { %v63_v6 = vand.u32 %v633_v0, %v702_v4  ;;  %v637_v7 = vld [vmem:[%s812_s0] ss:$16 sps:$4 sm:$0x1f]   ;;  %v638_v8 = vld [vmem:[%s812_s0 + $0x8] ss:$16 sps:$4 sm:$0x1f]   ;;  %v69_v9 = vand.u32 %v635_v5, %v702_v4  ;;  %vm589_vm4 = vmor %vm588_vm3, %vm55_vm0 }
   0x4   :  { %v60_v11 = vand.u32 %v637_v7, %v702_v4  ;;  %v66_v12 = vand.u32 %v638_v8, %v702_v4  ;;  %v640_v13 = vld [vmem:[%s814_s1] ss:$16 sps:$4 sm:$0x1f]   ;;  %v642_v14 = vld [vmem:[%s814_s1 + $0x4] ss:$16 sps:$4 sm:$0x1f]  }
   0x5   :  { %71 = vmatprep.subr.bf16.mxu0 %v63_v6  ;;  %114 = vmatprep.subr.bf16.mxu1 %v69_v9  ;;  %v643_v15 = vld [vmem:[%s814_s1 + $0x8] ss:$16 sps:$4 sm:$0x1f]   ;;  %v181_v16 = vand.u32 %v642_v14, %v702_v4  ;;  %v645_v17 = vld [vmem:[%s814_s1 + $0xc] ss:$16 sps:$4 sm:$0x1f]   ;;  %v178_v18 = vand.u32 %v640_v13, %v702_v4 }
   0x6   :  { %72 = vmatpush1.bf16.msra.mxu0 %v60_v11  ;;  %115 = vmatpush1.bf16.msra.mxu1 %v66_v12  ;;  %v184_v19 = vand.u32 %v643_v15, %v702_v4  ;;  %v648_v20 = vld [vmem:[%s815_s2 + $0x4] ss:$16 sps:$4 sm:$0x1f]   ;;  %v187_v21 = vand.u32 %v645_v17, %v702_v4  ;;  %v651_v23 = vld [vmem:[%s815_s2 + $0xc] ss:$16 sps:$4 sm:$0x1f]  }
   0x7   :  { %189 = vmatprep.subr.bf16.mxu0 %v181_v16  ;;  %v307_v22 = vand.u32 %v648_v20, %v702_v4  ;;  %v646_v24 = vld [vmem:[%s815_s2] ss:$16 sps:$4 sm:$0x1f]   ;;  %v649_v25 = vld [vmem:[%s815_s2 + $0x8] ss:$16 sps:$4 sm:$0x1f]   ;;  %v313_v26 = vand.u32 %v651_v23, %v702_v4 }
   0x8   :  { %232 = vmatprep.subr.bf16.mxu1 %v187_v21  ;;  %v654_v27 = vld [vmem:[%s816_s3 + $0x4] ss:$16 sps:$4 sm:$0x1f]   ;;  %v657_v28 = vld [vmem:[%s816_s3 + $0xc] ss:$16 sps:$4 sm:$0x1f]   ;;  %v304_v30 = vand.u32 %v646_v24, %v702_v4  ;;  %v310_v31 = vand.u32 %v649_v25, %v702_v4 }
   0x9   :  { %602 = vmatmul.mubr.msk.bf16.vlgmr.msra.gmra.mrb[0].mxu0 %vm51_vm2, %v718_v10  ;;  %603 = vmatmul.mubr.msk.bf16.vlgmr.msra.gmra.mrb[0].mxu1 %vm51_vm2, %v718_v10  ;;  %v535_v29 = vld [vmem:[%s817_s5] sm:$0xff]  ;;  %v425_v32 = vand.u32 %v654_v27, %v702_v4  ;;  %v431_v33 = vand.u32 %v657_v28, %v702_v4  ;;  %v655_v35 = vld [vmem:[%s816_s3 + $0x8] ss:$16 sps:$4 sm:$0x1f]  }
   0xa   :  { %190 = vmatpush1.bf16.msra.mxu0 %v178_v18  ;;  %233 = vmatpush1.bf16.msra.mxu1 %v184_v19  ;;  %v652_v34 = vld [vmem:[%s816_s3] ss:$16 sps:$4 sm:$0x1f]   ;;  %v428_v38 = vand.u32 %v655_v35, %v702_v4 }
   0xb   :  { %221 = vmatprep.mubr.bf16.mxu0 %v658_v1  ;;  %264 = vmatprep.mubr.bf16.mxu1 %v658_v1  ;;  %v422_v37 = vand.u32 %v652_v34, %v702_v4 }
   0xc   :  { %315 = vmatprep.subr.bf16.mxu0 %v307_v22  ;;  %358 = vmatprep.subr.bf16.mxu1 %v313_v26 }
   0xd   :  { %539 = vperm.xlu0 %632, %v535_v29  }
  0x11   :  { %608 = vmatmul.mubr.msk.bf16.vlgmr.msra.gmra.mrb[4].mxu0 %vm51_vm2, %v718_v10  ;;  %609 = vmatmul.mubr.msk.bf16.vlgmr.msra.gmra.mrb[4].mxu1 %vm51_vm2, %v718_v10 }
  0x12   :  { %316 = vmatpush1.bf16.msra.mxu0 %v304_v30  ;;  %359 = vmatpush1.bf16.msra.mxu1 %v310_v31 }
  0x13   :  { %347 = vmatprep.mubr.bf16.mxu0 %v658_v1  ;;  %390 = vmatprep.mubr.bf16.mxu1 %v658_v1 }
  0x14   :  { %433 = vmatprep.subr.bf16.mxu0 %v425_v32  ;;  %476 = vmatprep.subr.bf16.mxu1 %v431_v33 }
  0x15   :  { %544 = vperm.xlu0 %632, %v536_v36  }
  0x19   :  { %614 = vmatmul.mubr.msk.bf16.vlgmr.msra.gmra.mrb[8].mxu0 %vm51_vm2, %v718_v10  ;;  %615 = vmatmul.mubr.msk.bf16.vlgmr.msra.gmra.mrb[8].mxu1 %vm51_vm2, %v718_v10 }
  0x1a   :  { %434 = vmatpush1.bf16.msra.mxu0 %v422_v37  ;;  %477 = vmatpush1.bf16.msra.mxu1 %v428_v38 }
  0x1b   :  { %465 = vmatprep.mubr.bf16.mxu0 %v658_v1  ;;  %508 = vmatprep.mubr.bf16.mxu1 %v658_v1 }
  0x21   :  { %620 = vmatmul.mubr.msk.bf16.vlgmr.msra.gmra.mrb[12].mxu0 %vm51_vm2, %v718_v10  ;;  %621 = vmatmul.mubr.msk.bf16.vlgmr.msra.gmra.mrb[12].mxu1 %vm51_vm2, %v718_v10 }
  0x8c   :  { %v540_v7 = vpop.permute.xlu0 %539 }
  0x94   :  { %v545_v36 = vpop.permute.xlu0 %544 }
  0xdc   :  { %v105_v39 = vpop.f32.mrb[0].mxu0  ;;  %v148_v40 = vpop.f32.mrb[0].mxu1 }
  0xdd   :  { %v107_v41 = vpop.f32.mrb[1].mxu0  ;;  %v150_v42 = vpop.f32.mrb[1].mxu1 }
  0xde   :  { %v109_v43 = vpop.f32.mrb[2].mxu0  ;;  %v152_v44 = vpop.f32.mrb[2].mxu1 }
  0xdf   :  { %v111_v45 = vpop.f32.mrb[3].mxu0  ;;  %v154_v46 = vpop.f32.mrb[3].mxu1 }
  0xe4   :  { %v223_v47 = vpop.f32.mrb[4].mxu0  ;;  %v266_v48 = vpop.f32.mrb[4].mxu1 }
  0xe5   :  { %v275_v49 = vmax.f32 %v105_v39, %v223_v47  ;;  %v277_v50 = vmax.f32 %v148_v40, %v266_v48  ;;  %v225_v51 = vpop.f32.mrb[5].mxu0  ;;  %v268_v52 = vpop.f32.mrb[5].mxu1 }
  0xe6   :  { %v276_v53 = vmax.f32 %v107_v41, %v225_v51  ;;  %v278_v54 = vmax.f32 %v150_v42, %v268_v52  ;;  %v227_v55 = vpop.f32.mrb[6].mxu0  ;;  %v270_v56 = vpop.f32.mrb[6].mxu1 }
  0xe7   :  { %v279_v57 = vmax.f32 %v109_v43, %v227_v55  ;;  %v281_v58 = vmax.f32 %v152_v44, %v270_v56  ;;  %v229_v59 = vpop.f32.mrb[7].mxu0  ;;  %v272_v60 = vpop.f32.mrb[7].mxu1 }
  0xe8   :  { %v280_v61 = vmax.f32 %v111_v45, %v229_v59  ;;  %v282_v62 = vmax.f32 %v154_v46, %v272_v60 }
  0xec   :  { %v349_v63 = vpop.f32.mrb[8].mxu0  ;;  %v392_v0 = vpop.f32.mrb[8].mxu1 }
  0xed   :  { %v351_v1 = vpop.f32.mrb[9].mxu0  ;;  %v394_v2 = vpop.f32.mrb[9].mxu1 }
  0xee   :  { %v353_v3 = vpop.f32.mrb[10].mxu0  ;;  %v396_v4 = vpop.f32.mrb[10].mxu1 }
  0xef   :  { %v355_v5 = vpop.f32.mrb[11].mxu0  ;;  %v398_v6 = vpop.f32.mrb[11].mxu1 }
  0xf4   :  { %v467_v8 = vpop.f32.mrb[12].mxu0  ;;  %v510_v9 = vpop.f32.mrb[12].mxu1 }
  0xf5   :  { %v519_v10 = vmax.f32 %v349_v63, %v467_v8  ;;  %v521_v11 = vmax.f32 %v392_v0, %v510_v9  ;;  %v469_v12 = vpop.f32.mrb[13].mxu0  ;;  %v512_v13 = vpop.f32.mrb[13].mxu1 }
  0xf6   :  { %v520_v14 = vmax.f32 %v351_v1, %v469_v12  ;;  %v522_v15 = vmax.f32 %v394_v2, %v512_v13  ;;  %v471_v16 = vpop.f32.mrb[14].mxu0  ;;  %v514_v17 = vpop.f32.mrb[14].mxu1 }
  0xf7   :  { %v527_v18 = vmax.f32 %v275_v49, %v519_v10  ;;  %v529_v19 = vmax.f32 %v277_v50, %v521_v11  ;;  %v523_v20 = vmax.f32 %v353_v3, %v471_v16  ;;  %v525_v21 = vmax.f32 %v396_v4, %v514_v17  ;;  %v473_v22 = vpop.f32.mrb[15].mxu0  ;;  %v516_v23 = vpop.f32.mrb[15].mxu1 }
  0xf8   :  { %v528_v24 = vmax.f32 %v276_v53, %v520_v14  ;;  %v530_v25 = vmax.f32 %v278_v54, %v522_v15  ;;  %v524_v26 = vmax.f32 %v355_v5, %v473_v22  ;;  %v526_v27 = vmax.f32 %v398_v6, %v516_v23 }
  0xf9   :  { %v547_v28 = vadd.f32 %v540_v7, %v527_v18  ;;  %v549_v29 = vadd.f32 %v540_v7, %v529_v19  ;;  %v531_v30 = vmax.f32 %v279_v57, %v523_v20  ;;  %v533_v31 = vmax.f32 %v281_v58, %v525_v21 }
  0xfa   :  { %v548_v32 = vadd.f32 %v540_v7, %v528_v24  ;;  %v550_v33 = vadd.f32 %v540_v7, %v530_v25  ;;  %v532_v34 = vmax.f32 %v280_v61, %v524_v26  ;;  %v534_v35 = vmax.f32 %v282_v62, %v526_v27 }
  0xfb   :  { %v555_v37 = vmax.f32 %v547_v28, 0.0  ;;  %v557_v38 = vmax.f32 %v549_v29, 0.0  ;;  %v551_v39 = vadd.f32 %v545_v36, %v531_v30  ;;  %v553_v40 = vadd.f32 %v545_v36, %v533_v31 }
  0xfc   :  { %v556_v41 = vmax.f32 %v548_v32, 0.0  ;;  %v558_v42 = vmax.f32 %v550_v33, 0.0  ;;  %v552_v43 = vadd.f32 %v545_v36, %v532_v34  ;;  %v554_v44 = vadd.f32 %v545_v36, %v534_v35 }
  0xfd   :  { %v559_v45 = vmax.f32 %v551_v39, 0.0  ;;  %v561_v46 = vmax.f32 %v553_v40, 0.0 }
  0xfe   :  { %v626_v47 = vpack.c.bf16 %v556_v41, %v555_v37  ;;  %v627_v48 = vpack.c.bf16 %v558_v42, %v557_v38  ;;  %v560_v49 = vmax.f32 %v552_v43, 0.0  ;;  %v562_v50 = vmax.f32 %v554_v44, 0.0 }
 0x100   :  { %587 = vst [vmem:[%s818_s6] sm:$0xff] %v626_v47  ;;  %590 = vst.msk [vmem:[%s818_s6 + $0x8] sm:$0xff] %vm589_vm4, %v627_v48  ;;  %v628_v51 = vpack.c.bf16 %v560_v49, %v559_v45  ;;  %v629_v52 = vpack.c.bf16 %v562_v50, %v561_v46 }
 0x102   :  { %591 = vst [vmem:[%s818_s6 + $0x10] sm:$0xff] %v628_v51  ;;  %592 = vst.msk [vmem:[%s818_s6 + $0x18] sm:$0xff] %vm589_vm4, %v629_v52 }

// kernel: cnn_forward.4
= control target key start
LH: loop header
LB: loop body
LE: loop exit
PB: predicated region body
PF: predicated region fallthrough
CT: control target
= control target key end

     0   :  { %v707_v0 = vmov 0   ;;  %vm118_vm0 = vcmask 130048   ;;  %vm597_vm1 = vcmask 797696   ;;  %s955_s0 = inlined_call_operand.vmem [shape: bf16[144,98], index: 0, kind: input, shape index: {}]   ;;  %s956_s1 = inlined_call_operand.vmem [shape: bf16[144,98], index: 1, kind: input, shape index: {}]   ;;  %s957_s4 = inlined_call_operand.vmem [shape: bf16[32,144], index: 4, kind: input, shape index: {}]   ;;  %s958_s2 = inlined_call_operand.vmem [shape: bf16[144,98], index: 2, kind: input, shape index: {}]   ;;  %s959_s3 = inlined_call_operand.vmem [shape: bf16[144,98], index: 3, kind: input, shape index: {}]   ;;  %s960_s5 = inlined_call_operand.vmem [shape: f32[32,1], index: 5, kind: input, shape index: {}]   ;;  %s961_s6 = inlined_call_operand.vmem [shape: bf16[32,98], index: 6, kind: output, shape index: {}]  }
   0x1   :  { %125 = vmatprep.subr.bf16.mxu0 %v707_v0  ;;  %246 = vmatprep.subr.bf16.mxu1 %v707_v0  ;;  %v665_v1 = vld [vmem:[%s955_s0] sm:$0xff]   ;;  %v667_v3 = vld [vmem:[%s955_s0 + $0x8] sm:$0xff]   ;;  %v669_v5 = vld [vmem:[%s955_s0 + $0x10] sm:$0xff]  }
   0x2   :  { %v666_v2 = vld [vmem:[%s956_s1] sm:$0xff]   ;;  %663 = vset.pattern.permute.xlu0 %v707_v0  ;;  %664 = vset.pattern.permute.xlu1 %v707_v0  ;;  %v668_v4 = vld [vmem:[%s956_s1 + $0x8] sm:$0xff]   ;;  %v670_v6 = vld [vmem:[%s956_s1 + $0x10] sm:$0xff]  }
   0x3   :  { %126 = vmatpush1.bf16.msra.mxu0 %v665_v1  ;;  %247 = vmatpush1.bf16.msra.mxu1 %v666_v2  ;;  %v671_v7 = vld [vmem:[%s955_s0 + $0x18] sm:$0xff]   ;;  %v673_v9 = vld [vmem:[%s955_s0 + $0x20] sm:$0xff]   ;;  %v675_v11 = vld [vmem:[%s955_s0 + $0x28] sm:$0xff]  }
   0x4   :  { %127 = vmatprep.subr.bf16.mxu0 %v707_v0  ;;  %248 = vmatprep.subr.bf16.mxu1 %v707_v0  ;;  %v672_v8 = vld [vmem:[%s956_s1 + $0x18] sm:$0xff]   ;;  %v674_v10 = vld [vmem:[%s956_s1 + $0x20] sm:$0xff]   ;;  %v676_v13 = vld [vmem:[%s956_s1 + $0x28] sm:$0xff]  }
   0x5   :  { %v791_v12 = vld [vmem:[%s957_s4 + $0x4] ss:$8 sps:$4 sm:$0xff]   ;;  %v677_v14 = vld [vmem:[%s955_s0 + $0x30] sm:$0xff]   ;;  %v679_v16 = vld [vmem:[%s955_s0 + $0x38] sm:$0xff]  }
   0x6   :  { %619 = vmatprep.mubr.msk.bf16.mxu0 %vm118_vm0, %v791_v12  ;;  %630 = vmatprep.mubr.msk.bf16.mxu1 %vm118_vm0, %v791_v12  ;;  %v678_v15 = vld [vmem:[%s956_s1 + $0x30] sm:$0xff]   ;;  %v680_v17 = vld [vmem:[%s956_s1 + $0x38] sm:$0xff]   ;;  %v681_v18 = vld [vmem:[%s955_s0 + $0x40] sm:$0xff]  }
   0x7   :  { %128 = vmatpush1.bf16.msra.mxu0 %v667_v3  ;;  %249 = vmatpush1.bf16.msra.mxu1 %v668_v4  ;;  %v682_v19 = vld [vmem:[%s956_s1 + $0x40] sm:$0xff]   ;;  %v842_v23 = vld [vmem:[%s957_s4 + $0x14] ss:$8 sps:$4 sm:$0xff]   ;;  %v688_v24 = vld [vmem:[%s958_s2 + $0x8] sm:$0xff]  }
   0x8   :  { %129 = vmatprep.subr.bf16.mxu0 %v707_v0  ;;  %250 = vmatprep.subr.bf16.mxu1 %v707_v0  ;;  %v829_v20 = vld [vmem:[%s957_s4] ss:$8 sps:$4 sm:$0xff]   ;;  %v551_v27 = vld [vmem:[%s960_s5 + $0x10] sm:$0xff]  ;;  %v692_v32 = vld [vmem:[%s958_s2 + $0x18] sm:$0xff]  }
   0x9   :  { %v686_v21 = vld [vmem:[%s958_s2] sm:$0xff]   ;;  %v689_v26 = vld [vmem:[%s959_s3 + $0x8] sm:$0xff]   ;;  %v700_v28 = vld [vmem:[%s957_s4 + $0x10] ss:$8 sps:$4 sm:$0xff]   ;;  %565 = vperm.xlu1 %664, %v551_v27  }
   0xa   :  { %v687_v22 = vld [vmem:[%s959_s3] sm:$0xff]   ;;  %v690_v29 = vld [vmem:[%s958_s2 + $0x10] sm:$0xff]   ;;  %v550_v30 = vld [vmem:[%s960_s5 + $0x8] sm:$0xff] }
   0xb   :  { %130 = vmatpush1.bf16.msra.mxu0 %v669_v5  ;;  %251 = vmatpush1.bf16.msra.mxu1 %v670_v6  ;;  %v549_v25 = vld [vmem:[%s960_s5] sm:$0xff]  ;;  %v691_v31 = vld [vmem:[%s959_s3 + $0x10] sm:$0xff]   ;;  %v552_v33 = vld [vmem:[%s960_s5 + $0x18] sm:$0xff] }
   0xc   :  { %131 = vmatprep.subr.bf16.mxu0 %v707_v0  ;;  %252 = vmatprep.subr.bf16.mxu1 %v707_v0  ;;  %v693_v34 = vld [vmem:[%s959_s3 + $0x18] sm:$0xff]   ;;  %v694_v35 = vld [vmem:[%s958_s2 + $0x20] sm:$0xff]   ;;  %v696_v37 = vld [vmem:[%s958_s2 + $0x28] sm:$0xff]  }
   0xd   :  { %555 = vperm.xlu0 %663, %v549_v25   ;;  %570 = vperm.xlu1 %664, %v552_v33   ;;  %v695_v36 = vld [vmem:[%s959_s3 + $0x20] sm:$0xff]   ;;  %v697_v38 = vld [vmem:[%s959_s3 + $0x28] sm:$0xff]   ;;  %v701_v39 = vld [vmem:[%s958_s2 + $0x30] sm:$0xff]  }
   0xe   :  { %v702_v40 = vld [vmem:[%s959_s3 + $0x30] sm:$0xff]   ;;  %v703_v41 = vld [vmem:[%s958_s2 + $0x38] sm:$0xff]   ;;  %v705_v43 = vld [vmem:[%s958_s2 + $0x40] sm:$0xff]  }
   0xf   :  { %132 = vmatpush1.bf16.msra.mxu0 %v671_v7  ;;  %253 = vmatpush1.bf16.msra.mxu1 %v672_v8  ;;  %v704_v42 = vld [vmem:[%s959_s3 + $0x38] sm:$0xff]   ;;  %v706_v44 = vld [vmem:[%s959_s3 + $0x40] sm:$0xff]  }
  0x10   :  { %133 = vmatprep.subr.bf16.mxu0 %v707_v0  ;;  %254 = vmatprep.subr.bf16.mxu1 %v707_v0 }
  0x11   :  { %560 = vperm.xlu0 %663, %v550_v30  }
  0x13   :  { %134 = vmatpush1.bf16.msra.mxu0 %v673_v9  ;;  %255 = vmatpush1.bf16.msra.mxu1 %v674_v10 }
  0x14   :  { %135 = vmatprep.subr.bf16.mxu0 %v707_v0  ;;  %256 = vmatprep.subr.bf16.mxu1 %v707_v0 }
  0x17   :  { %136 = vmatpush1.bf16.msra.mxu0 %v675_v11  ;;  %257 = vmatpush1.bf16.msra.mxu1 %v676_v13 }
  0x18   :  { %137 = vmatprep.subr.bf16.mxu0 %v707_v0  ;;  %258 = vmatprep.subr.bf16.mxu1 %v707_v0 }
  0x1b   :  { %138 = vmatpush1.bf16.msra.mxu0 %v677_v14  ;;  %259 = vmatpush1.bf16.msra.mxu1 %v678_v15 }
  0x1c   :  { %139 = vmatprep.subr.bf16.mxu0 %v707_v0  ;;  %260 = vmatprep.subr.bf16.mxu1 %v707_v0 }
  0x1f   :  { %140 = vmatpush1.bf16.msra.mxu0 %v679_v16  ;;  %261 = vmatpush1.bf16.msra.mxu1 %v680_v17 }
  0x20   :  { %141 = vmatprep.subr.bf16.mxu0 %v707_v0  ;;  %262 = vmatprep.subr.bf16.mxu1 %v707_v0 }
  0x23   :  { %142 = vmatpush1.bf16.msra.mxu0 %v681_v18  ;;  %263 = vmatpush1.bf16.msra.mxu1 %v682_v19 }
  0x24   :  { %371 = vmatprep.subr.bf16.mxu0 %v707_v0  ;;  %492 = vmatprep.subr.bf16.mxu1 %v707_v0 }
  0x26   :  { %158 = vmatmul.mubr.bf16.vlgmr.msra.gmra.mrb[0].mxu0 %v829_v20  ;;  %279 = vmatmul.mubr.bf16.vlgmr.msra.gmra.mrb[0].mxu1 %v829_v20 }
  0x27   :  { %372 = vmatpush1.bf16.msra.mxu0 %v686_v21  ;;  %493 = vmatpush1.bf16.msra.mxu1 %v687_v22 }
  0x28   :  { %373 = vmatprep.subr.bf16.mxu0 %v707_v0  ;;  %494 = vmatprep.subr.bf16.mxu1 %v707_v0 }
  0x29   :  { %620 = vmatprep.mubr.msk.bf16.mxu0 %vm118_vm0, %v842_v23  ;;  %631 = vmatprep.mubr.msk.bf16.mxu1 %vm118_vm0, %v842_v23 }
  0x2b   :  { %374 = vmatpush1.bf16.msra.mxu0 %v688_v24  ;;  %495 = vmatpush1.bf16.msra.mxu1 %v689_v26 }
  0x2c   :  { %375 = vmatprep.subr.bf16.mxu0 %v707_v0  ;;  %496 = vmatprep.subr.bf16.mxu1 %v707_v0 }
  0x2e   :  { %166 = vmatmul.mubr.bf16.gmra.mrb[4].mxu0 %v700_v28  ;;  %287 = vmatmul.mubr.bf16.gmra.mrb[4].mxu1 %v700_v28 }
  0x2f   :  { %376 = vmatpush1.bf16.msra.mxu0 %v690_v29  ;;  %497 = vmatpush1.bf16.msra.mxu1 %v691_v31 }
  0x30   :  { %377 = vmatprep.subr.bf16.mxu0 %v707_v0  ;;  %498 = vmatprep.subr.bf16.mxu1 %v707_v0 }
  0x31   :  { %641 = vmatprep.mubr.msk.bf16.mxu0 %vm118_vm0, %v791_v12  ;;  %652 = vmatprep.mubr.msk.bf16.mxu1 %vm118_vm0, %v791_v12 }
  0x33   :  { %378 = vmatpush1.bf16.msra.mxu0 %v692_v32  ;;  %499 = vmatpush1.bf16.msra.mxu1 %v693_v34 }
  0x34   :  { %379 = vmatprep.subr.bf16.mxu0 %v707_v0  ;;  %500 = vmatprep.subr.bf16.mxu1 %v707_v0 }
  0x37   :  { %380 = vmatpush1.bf16.msra.mxu0 %v694_v35  ;;  %501 = vmatpush1.bf16.msra.mxu1 %v695_v36 }
  0x38   :  { %381 = vmatprep.subr.bf16.mxu0 %v707_v0  ;;  %502 = vmatprep.subr.bf16.mxu1 %v707_v0 }
  0x3b   :  { %382 = vmatpush1.bf16.msra.mxu0 %v696_v37  ;;  %503 = vmatpush1.bf16.msra.mxu1 %v697_v38 }
  0x3c   :  { %383 = vmatprep.subr.bf16.mxu0 %v707_v0  ;;  %504 = vmatprep.subr.bf16.mxu1 %v707_v0 }
  0x3f   :  { %384 = vmatpush1.bf16.msra.mxu0 %v701_v39  ;;  %505 = vmatpush1.bf16.msra.mxu1 %v702_v40 }
  0x40   :  { %385 = vmatprep.subr.bf16.mxu0 %v707_v0  ;;  %506 = vmatprep.subr.bf16.mxu1 %v707_v0 }
  0x43   :  { %386 = vmatpush1.bf16.msra.mxu0 %v703_v41  ;;  %507 = vmatpush1.bf16.msra.mxu1 %v704_v42 }
  0x44   :  { %387 = vmatprep.subr.bf16.mxu0 %v707_v0  ;;  %508 = vmatprep.subr.bf16.mxu1 %v707_v0 }
  0x47   :  { %388 = vmatpush1.bf16.msra.mxu0 %v705_v43  ;;  %509 = vmatpush1.bf16.msra.mxu1 %v706_v44 }
  0x4a   :  { %404 = vmatmul.mubr.bf16.vlgmr.msra.gmra.mrb[8].mxu0 %v829_v20  ;;  %525 = vmatmul.mubr.bf16.vlgmr.msra.gmra.mrb[8].mxu1 %v829_v20 }
  0x4b   :  { %642 = vmatprep.mubr.msk.bf16.mxu0 %vm118_vm0, %v842_v23  ;;  %653 = vmatprep.mubr.msk.bf16.mxu1 %vm118_vm0, %v842_v23 }
  0x52   :  { %412 = vmatmul.mubr.bf16.gmra.mrb[12].mxu0 %v700_v28  ;;  %533 = vmatmul.mubr.bf16.gmra.mrb[12].mxu1 %v700_v28 }
  0x88   :  { %v566_v17 = vpop.permute.xlu1 %565 }
  0x8c   :  { %v556_v1 = vpop.permute.xlu0 %555  ;;  %v571_v35 = vpop.permute.xlu1 %570 }
  0x90   :  { %v561_v13 = vpop.permute.xlu0 %560 }
  0xf9   :  { %v159_v45 = vpop.f32.mrb[0].mxu0  ;;  %v280_v46 = vpop.f32.mrb[0].mxu1 }
  0xfa   :  { %v161_v47 = vpop.f32.mrb[1].mxu0  ;;  %v295_v48 = vmax.f32 %v159_v45, %v280_v46  ;;  %v282_v49 = vpop.f32.mrb[1].mxu1 }
  0xfb   :  { %v162_v50 = vpop.f32.mrb[2].mxu0  ;;  %v283_v51 = vpop.f32.mrb[2].mxu1 }
  0xfc   :  { %v164_v52 = vpop.f32.mrb[3].mxu0  ;;  %v296_v53 = vmax.f32 %v162_v50, %v283_v51  ;;  %v285_v54 = vpop.f32.mrb[3].mxu1 }
 0x101   :  { %v167_v55 = vpop.f32.mrb[4].mxu0  ;;  %v288_v56 = vpop.f32.mrb[4].mxu1 }
 0x102   :  { %v169_v57 = vpop.f32.mrb[5].mxu0  ;;  %v297_v58 = vmax.f32 %v167_v55, %v288_v56  ;;  %v290_v59 = vpop.f32.mrb[5].mxu1 }
 0x103   :  { %v170_v60 = vpop.f32.mrb[6].mxu0  ;;  %v291_v61 = vpop.f32.mrb[6].mxu1 }
 0x104   :  { %v172_v62 = vpop.f32.mrb[7].mxu0  ;;  %v298_v63 = vmax.f32 %v170_v60, %v291_v61  ;;  %v293_v0 = vpop.f32.mrb[7].mxu1 }
 0x11d   :  { %v405_v2 = vpop.f32.mrb[8].mxu0  ;;  %v526_v3 = vpop.f32.mrb[8].mxu1 }
 0x11e   :  { %v407_v4 = vpop.f32.mrb[9].mxu0  ;;  %v541_v5 = vmax.f32 %v405_v2, %v526_v3  ;;  %v528_v6 = vpop.f32.mrb[9].mxu1 }
 0x11f   :  { %v408_v7 = vpop.f32.mrb[10].mxu0  ;;  %v529_v8 = vpop.f32.mrb[10].mxu1 }
 0x120   :  { %v410_v9 = vpop.f32.mrb[11].mxu0  ;;  %v545_v10 = vmax.f32 %v295_v48, %v541_v5  ;;  %v542_v11 = vmax.f32 %v408_v7, %v529_v8  ;;  %v531_v12 = vpop.f32.mrb[11].mxu1 }
 0x122   :  { %v573_v14 = vadd.f32 %v556_v1, %v545_v10  ;;  %v546_v15 = vmax.f32 %v296_v53, %v542_v11 }
 0x124   :  { %v577_v16 = vmax.f32 %v573_v14, 0.0  ;;  %v574_v18 = vadd.f32 %v561_v13, %v546_v15 }
 0x125   :  { %v413_v19 = vpop.f32.mrb[12].mxu0  ;;  %v534_v20 = vpop.f32.mrb[12].mxu1 }
 0x126   :  { %v415_v21 = vpop.f32.mrb[13].mxu0  ;;  %v658_v22 = vpack.c.bf16 %v577_v16, %v577_v16  ;;  %v578_v23 = vmax.f32 %v574_v18, 0.0  ;;  %v543_v24 = vmax.f32 %v413_v19, %v534_v20  ;;  %v536_v25 = vpop.f32.mrb[13].mxu1 }
 0x127   :  { %v416_v26 = vpop.f32.mrb[14].mxu0  ;;  %v537_v27 = vpop.f32.mrb[14].mxu1 }
 0x128   :  { %v418_v28 = vpop.f32.mrb[15].mxu0  ;;  %598 = vst.msk [vmem:[%s961_s6] sm:$0xf] %vm597_vm1, %v658_v22  ;;  %v659_v29 = vpack.c.bf16 %v578_v23, %v578_v23  ;;  %v547_v30 = vmax.f32 %v297_v58, %v543_v24  ;;  %v544_v31 = vmax.f32 %v416_v26, %v537_v27  ;;  %v539_v32 = vpop.f32.mrb[15].mxu1 }
 0x12a   :  { %599 = vst.msk [vmem:[%s961_s6 + $0x4] sm:$0xf] %vm597_vm1, %v659_v29  ;;  %v575_v33 = vadd.f32 %v566_v17, %v547_v30  ;;  %v548_v34 = vmax.f32 %v298_v63, %v544_v31 }
 0x12c   :  { %v579_v36 = vmax.f32 %v575_v33, 0.0  ;;  %v576_v37 = vadd.f32 %v571_v35, %v548_v34 }
 0x12e   :  { %v660_v38 = vpack.c.bf16 %v579_v36, %v579_v36  ;;  %v580_v39 = vmax.f32 %v576_v37, 0.0 }
 0x130   :  { %600 = vst.msk [vmem:[%s961_s6 + $0x8] sm:$0xf] %vm597_vm1, %v660_v38  ;;  %v661_v40 = vpack.c.bf16 %v580_v39, %v580_v39 }
 0x132   :  { %601 = vst.msk [vmem:[%s961_s6 + $0xc] sm:$0xf] %vm597_vm1, %v661_v40 }

// kernel: cnn_forward.5
= control target key start
LH: loop header
LB: loop body
LE: loop exit
PB: predicated region body
PF: predicated region fallthrough
CT: control target
= control target key end

     0   :  { %v3240_v1 = vmov 0   ;;  %vm1533_vm0 = vcmask 261120   ;;  %vm3242_vm1 = vmmov 0   ;;  %vm2322_vm2 = vcmask 15360   ;;  %s4097_s0 = inlined_call_operand.vmem [shape: bf16[1568,2], index: 0, kind: input, shape index: {}]   ;;  %s4098_s1 = inlined_call_operand.vmem [shape: bf16[128,1568], index: 1, kind: input, shape index: {}]   ;;  %s4099_s2 = inlined_call_operand.vmem [shape: f32[128,1], index: 2, kind: input, shape index: {}]   ;;  %s4100_s4 = inlined_call_operand.vmem [shape: f32[10,1], index: 4, kind: input, shape index: {}]   ;;  %s4101_s3 = inlined_call_operand.vmem [shape: bf16[10,128], index: 3, kind: input, shape index: {}]   ;;  %s4102_s5 = inlined_call_operand.vmem [shape: f32[10,2], index: 5, kind: output, shape index: {}]  }
   0x1   :  { %v2989_v0 = vld [vmem:[%s4097_s0 + $0x40] sm:$0xff]   ;;  %2987 = vset.pattern.permute.xlu0 %v3240_v1  ;;  %2988 = vset.pattern.permute.xlu1 %v3240_v1  ;;  %v2993_v5 = vld [vmem:[%s4097_s0 + $0x48] sm:$0xff]   ;;  %v2997_v9 = vld [vmem:[%s4097_s0 + $0x50] sm:$0xff]   ;;  %vm2324_vm3 = vcmask 9216  }
   0x2   :  { %v2990_v2 = vld [vmem:[%s4097_s0] sm:$0xff]   ;;  %2541 = vmatprep.subr.bf16.mxu0 %v2989_v0  ;;  %v2994_v6 = vld [vmem:[%s4097_s0 + $0x8] sm:$0xff]   ;;  %v2998_v10 = vld [vmem:[%s4097_s0 + $0x10] sm:$0xff]  }
   0x3   :  { %v2991_v3 = vld [vmem:[%s4097_s0 + $0xc0] sm:$0xff]   ;;  %2542 = vmatpush3.bf16.msra.mxu0 %v2990_v2  ;;  %v2995_v7 = vld [vmem:[%s4097_s0 + $0xc8] sm:$0xff]   ;;  %v2999_v11 = vld [vmem:[%s4097_s0 + $0xd0] sm:$0xff]  }
   0x4   :  { %v2992_v4 = vld [vmem:[%s4097_s0 + $0x80] sm:$0xff]   ;;  %2605 = vmatprep.subr.bf16.mxu1 %v2991_v3  ;;  %2543 = vmatprep.subr.bf16.mxu0 %v2993_v5  ;;  %v2996_v8 = vld [vmem:[%s4097_s0 + $0x88] sm:$0xff]   ;;  %v3000_v12 = vld [vmem:[%s4097_s0 + $0x90] sm:$0xff]  }
   0x5   :  { %2606 = vmatpush3.bf16.msra.mxu1 %v2992_v4  ;;  %v3001_v13 = vld [vmem:[%s4097_s0 + $0x58] sm:$0xff]   ;;  %v3005_v17 = vld [vmem:[%s4097_s0 + $0x60] sm:$0xff]   ;;  %v3009_v21 = vld [vmem:[%s4097_s0 + $0x68] sm:$0xff]  }
   0x6   :  { %2607 = vmatprep.subr.bf16.mxu1 %v2995_v7  ;;  %v3002_v14 = vld [vmem:[%s4097_s0 + $0x18] sm:$0xff]   ;;  %v3006_v18 = vld [vmem:[%s4097_s0 + $0x20] sm:$0xff]   ;;  %v3010_v22 = vld [vmem:[%s4097_s0 + $0x28] sm:$0xff]  }
   0x7   :  { %2544 = vmatpush3.bf16.msra.mxu0 %v2994_v6  ;;  %v3003_v15 = vld [vmem:[%s4097_s0 + $0xd8] sm:$0xff]   ;;  %v3007_v19 = vld [vmem:[%s4097_s0 + $0xe0] sm:$0xff]   ;;  %v3011_v23 = vld [vmem:[%s4097_s0 + $0xe8] sm:$0xff]  }
   0x8   :  { %2545 = vmatprep.subr.bf16.mxu0 %v2997_v9  ;;  %v3004_v16 = vld [vmem:[%s4097_s0 + $0x98] sm:$0xff]   ;;  %v3008_v20 = vld [vmem:[%s4097_s0 + $0xa0] sm:$0xff]   ;;  %v3012_v24 = vld [vmem:[%s4097_s0 + $0xa8] sm:$0xff]  }
   0x9   :  { %2608 = vmatpush3.bf16.msra.mxu1 %v2996_v8  ;;  %v3013_v25 = vld [vmem:[%s4097_s0 + $0x70] sm:$0xff]   ;;  %v3017_v29 = vld [vmem:[%s4097_s0 + $0x78] sm:$0xff]   ;;  %v3026_v36 = vld [vmem:[%s4098_s1 + $0xc] ss:$52 sps:$4 sm:$0xff]  }
   0xa   :  { %2609 = vmatprep.subr.bf16.mxu1 %v2999_v11  ;;  %v3014_v26 = vld [vmem:[%s4097_s0 + $0x30] sm:$0xff]   ;;  %v3018_v30 = vld [vmem:[%s4097_s0 + $0x38] sm:$0xff]   ;;  %v3027_v37 = vld [vmem:[%s4098_s1 + $0x6c] ss:$52 sps:$4 sm:$0xff]   ;;  %1687 = vmatprep.mubr.bf16.mxu1 %v3026_v36 }
   0xb   :  { %2546 = vmatpush3.bf16.msra.mxu0 %v2998_v10  ;;  %v3015_v27 = vld [vmem:[%s4097_s0 + $0xf0] sm:$0xff]   ;;  %v3019_v31 = vld [vmem:[%s4097_s0 + $0xf8] sm:$0xff]   ;;  %v3048_v43 = vld [vmem:[%s4097_s0 + $0x140] sm:$0xff]  }
   0xc   :  { %2547 = vmatprep.subr.bf16.mxu0 %v3001_v13  ;;  %v3016_v28 = vld [vmem:[%s4097_s0 + $0xb0] sm:$0xff]   ;;  %v3022_v33 = vld [vmem:[%s4098_s1 + $0x4] ss:$52 sps:$4 sm:$0xff]   ;;  %v3024_v35 = vld [vmem:[%s4098_s1 + $0x8] ss:$52 sps:$4 sm:$0xff]  }
   0xd   :  { %2610 = vmatpush3.bf16.msra.mxu1 %v3000_v12  ;;  %v3020_v32 = vld [vmem:[%s4098_s1] ss:$52 sps:$4 sm:$0xff]   ;;  %v3023_v34 = vld [vmem:[%s4097_s0 + $0xb8] sm:$0xff]   ;;  %1590 = vmatprep.mubr.bf16.mxu0 %v3022_v33  ;;  %v3032_v41 = vld [vmem:[%s4098_s1 + $0x70] ss:$52 sps:$4 sm:$0xff]  }
   0xe   :  { %2611 = vmatprep.subr.bf16.mxu1 %v3003_v15  ;;  %v3030_v38 = vld [vmem:[%s4098_s1 + $0x74] ss:$52 sps:$4 sm:$0xff]   ;;  %v3036_v42 = vld [vmem:[%s4098_s1 + $0xdc] ss:$52 sps:$4 sm:$0xff]   ;;  %v3051_v45 = vld [vmem:[%s4097_s0 + $0x100] sm:$0xff]  }
   0xf   :  { %2548 = vmatpush3.bf16.msra.mxu0 %v3002_v14  ;;  %v3029_v39 = vld [vmem:[%s4098_s1 + $0x68] ss:$52 sps:$4 sm:$0xff]   ;;  %v3035_v44 = vld [vmem:[%s4098_s1 + $0xd0] ss:$52 sps:$4 sm:$0xff]   ;;  %v3038_v47 = vld [vmem:[%s4098_s1 + $0xd8] ss:$52 sps:$4 sm:$0xff]  }
  0x10   :  { %2549 = vmatprep.subr.bf16.mxu0 %v3005_v17  ;;  %v3033_v40 = vld [vmem:[%s4098_s1 + $0xd4] ss:$52 sps:$4 sm:$0xff]   ;;  %v3039_v46 = vld [vmem:[%s4098_s1 + $0x13c] ss:$52 sps:$4 sm:$0xff]   ;;  %v3053_v48 = vld [vmem:[%s4097_s0 + $0x1c0] sm:$0xff]  }
  0x11   :  { %2612 = vmatpush3.bf16.msra.mxu1 %v3004_v16  ;;  %v3042_v49 = vld [vmem:[%s4098_s1 + $0x144] ss:$52 sps:$4 sm:$0xff]   ;;  %v3055_v51 = vld [vmem:[%s4097_s0 + $0x148] sm:$0xff]   ;;  %v3062_v56 = vld [vmem:[%s4097_s0 + $0x150] sm:$0xff]  }
  0x12   :  { %2613 = vmatprep.subr.bf16.mxu1 %v3007_v19  ;;  %v3054_v50 = vld [vmem:[%s4097_s0 + $0x180] sm:$0xff]   ;;  %v3056_v52 = vld [vmem:[%s4097_s0 + $0x108] sm:$0xff]   ;;  %v3065_v60 = vld [vmem:[%s4097_s0 + $0x110] sm:$0xff]  }
  0x13   :  { %2550 = vmatpush3.bf16.msra.mxu0 %v3006_v18  ;;  %v3057_v53 = vld [vmem:[%s4097_s0 + $0x1c8] sm:$0xff]   ;;  %v3044_v57 = vld [vmem:[%s4098_s1 + $0x140] ss:$52 sps:$4 sm:$0xff]   ;;  %v3045_v58 = vld [vmem:[%s4098_s1 + $0x1a4] ss:$52 sps:$4 sm:$0xff]  }
  0x14   :  { %2551 = vmatprep.subr.bf16.mxu0 %v3009_v21  ;;  %v3041_v54 = vld [vmem:[%s4098_s1 + $0x138] ss:$52 sps:$4 sm:$0xff]   ;;  %v3067_v61 = vld [vmem:[%s4097_s0 + $0x1d0] sm:$0xff]   ;;  %v3052_v5 = vld [vmem:[%s4098_s1 + $0x1a8] ss:$52 sps:$4 sm:$0xff]  }
  0x15   :  { %2614 = vmatpush3.bf16.msra.mxu1 %v3008_v20  ;;  %v3060_v55 = vld [vmem:[%s4097_s0 + $0x188] sm:$0xff]   ;;  %v3068_v62 = vld [vmem:[%s4097_s0 + $0x190] sm:$0xff]   ;;  %v3069_v63 = vld [vmem:[%s4097_s0 + $0x158] sm:$0xff]  }
  0x16   :  { %2615 = vmatprep.subr.bf16.mxu1 %v3011_v23  ;;  %v3049_v59 = vld [vmem:[%s4098_s1 + $0x1ac] ss:$52 sps:$4 sm:$0xff]   ;;  %v3070_v1 = vld [vmem:[%s4097_s0 + $0x118] sm:$0xff]   ;;  %v3063_v7 = vld [vmem:[%s4098_s1 + $0x214] ss:$52 sps:$4 sm:$0xff]  }
  0x17   :  { %2552 = vmatpush3.bf16.msra.mxu0 %v3010_v22  ;;  %v3047_v0 = vld [vmem:[%s4098_s1 + $0x1a0] ss:$52 sps:$4 sm:$0xff]   ;;  %v3071_v2 = vld [vmem:[%s4097_s0 + $0x1d8] sm:$0xff]   ;;  %v3083_v13 = vld [vmem:[%s4097_s0 + $0x168] sm:$0xff]  }
  0x18   :  { %2553 = vmatprep.subr.bf16.mxu0 %v3013_v25  ;;  %v3058_v3 = vld [vmem:[%s4098_s1 + $0x20c] ss:$52 sps:$4 sm:$0xff]   ;;  %v3074_v4 = vld [vmem:[%s4097_s0 + $0x198] sm:$0xff]   ;;  %v3072_v11 = vld [vmem:[%s4098_s1 + $0x274] ss:$52 sps:$4 sm:$0xff]  }
  0x19   :  { %2616 = vmatpush3.bf16.msra.mxu1 %v3012_v24  ;;  %v3076_v6 = vld [vmem:[%s4097_s0 + $0x160] sm:$0xff]   ;;  %v3061_v9 = vld [vmem:[%s4098_s1 + $0x208] ss:$52 sps:$4 sm:$0xff]   ;;  %v3090_v19 = vld [vmem:[%s4097_s0 + $0x170] sm:$0xff]  }
  0x1a   :  { %2617 = vmatprep.subr.bf16.mxu1 %v3015_v27  ;;  %v3079_v8 = vld [vmem:[%s4097_s0 + $0x120] sm:$0xff]   ;;  %v3084_v14 = vld [vmem:[%s4097_s0 + $0x128] sm:$0xff]   ;;  %v3077_v17 = vld [vmem:[%s4098_s1 + $0x27c] ss:$52 sps:$4 sm:$0xff]  }
  0x1b   :  { %2554 = vmatpush3.bf16.msra.mxu0 %v3014_v26  ;;  %v3081_v10 = vld [vmem:[%s4097_s0 + $0x1e0] sm:$0xff]   ;;  %v3085_v15 = vld [vmem:[%s4097_s0 + $0x1e8] sm:$0xff]   ;;  %v3093_v21 = vld [vmem:[%s4097_s0 + $0x130] sm:$0xff]  }
  0x1c   :  { %2555 = vmatprep.subr.bf16.mxu0 %v3017_v29  ;;  %v3082_v12 = vld [vmem:[%s4097_s0 + $0x1a0] sm:$0xff]   ;;  %v3088_v18 = vld [vmem:[%s4097_s0 + $0x1a8] sm:$0xff]   ;;  %v3086_v22 = vld [vmem:[%s4098_s1 + $0x2dc] ss:$52 sps:$4 sm:$0xff]  }
  0x1d   :  { %2618 = vmatpush3.bf16.msra.mxu1 %v3016_v28  ;;  %v3066_v16 = vld [vmem:[%s4098_s1 + $0x210] ss:$52 sps:$4 sm:$0xff]   ;;  %v3080_v23 = vld [vmem:[%s4098_s1 + $0x278] ss:$52 sps:$4 sm:$0xff]   ;;  %v3094_v33 = vld [vmem:[%s4098_s1 + $0x2e0] ss:$52 sps:$4 sm:$0xff]  }
  0x1e   :  { %2619 = vmatprep.subr.bf16.mxu1 %v3019_v31  ;;  %v3075_v20 = vld [vmem:[%s4098_s1 + $0x270] ss:$52 sps:$4 sm:$0xff]   ;;  %v3097_v27 = vld [vmem:[%s4097_s0 + $0x178] sm:$0xff]  }
  0x1f   :  { %2556 = vmatpush3.bf16.msra.mxu0 %v3018_v30  ;;  %v3095_v24 = vld [vmem:[%s4097_s0 + $0x1f0] sm:$0xff]   ;;  %v3091_v25 = vld [vmem:[%s4098_s1 + $0x2e4] ss:$52 sps:$4 sm:$0xff]  }
  0x20   :  { %2669 = vmatprep.subr.bf16.mxu0 %v3048_v43  ;;  %v3096_v26 = vld [vmem:[%s4097_s0 + $0x1b0] sm:$0xff]   ;;  %v3098_v28 = vld [vmem:[%s4097_s0 + $0x138] sm:$0xff]  }
  0x21   :  { %2620 = vmatpush3.bf16.msra.mxu1 %v3023_v34  ;;  %v3099_v29 = vld [vmem:[%s4097_s0 + $0x1f8] sm:$0xff]   ;;  %v3100_v36 = vld [vmem:[%s4098_s1 + $0x10] ss:$52 sps:$4 sm:$0xff]  }
  0x22   :  { %1591 = vmatmul.mubr.bf16.vlgmr.msra.gmra.mrb[0].mxu0 %v3020_v32  ;;  %2733 = vmatprep.subr.bf16.mxu1 %v3053_v48  ;;  %v3103_v30 = vld [vmem:[%s4097_s0 + $0x1b8] sm:$0xff]   ;;  %v3102_v32 = vld [vmem:[%s4098_s1 + $0x14] ss:$52 sps:$4 sm:$0xff]   ;;  %v3134_v48 = vld [vmem:[%s4097_s0 + $0x280] sm:$0xff]  }
  0x23   :  { %1598 = vmatprep.mubr.bf16.mxu0 %v3027_v37  ;;  %2670 = vmatpush3.bf16.msra.mxu0 %v3051_v45  ;;  %v3089_v31 = vld [vmem:[%s4098_s1 + $0x2d8] ss:$52 sps:$4 sm:$0xff]   ;;  %v3106_v34 = vld [vmem:[%s4098_s1 + $0x1c] ss:$52 sps:$4 sm:$0xff]   ;;  %v3131_v45 = vld [vmem:[%s4097_s0 + $0x200] sm:$0xff]  }
  0x24   :  { %1688 = vmatmul.mubr.bf16.vlgmr.msra.gmra.mrb[0].mxu1 %v3024_v35  ;;  %2671 = vmatprep.subr.bf16.mxu0 %v3055_v51  ;;  %v329_v35 = vld [vmem:[%s4099_s2] sm:$0xff]  ;;  %v330_v37 = vld [vmem:[%s4099_s2 + $0x8] sm:$0xff]  ;;  %v332_v43 = vld [vmem:[%s4099_s2 + $0x18] sm:$0xff] }
  0x25   :  { %1695 = vmatprep.mubr.bf16.mxu1 %v3030_v38  ;;  %2734 = vmatpush3.bf16.msra.mxu1 %v3054_v50  ;;  %v3107_v38 = vld [vmem:[%s4098_s1 + $0x7c] ss:$52 sps:$4 sm:$0xff]   ;;  %v3135_v50 = vld [vmem:[%s4097_s0 + $0x248] sm:$0xff]  }
  0x26   :  { %2735 = vmatprep.subr.bf16.mxu1 %v3057_v53  ;;  %347 = vperm.xlu0 %2987, %v329_v35   ;;  %v3116_v51 = vld [vmem:[%s4098_s1 + $0xec] ss:$52 sps:$4 sm:$0xff]   ;;  %v3179_v35 = vld [vmem:[%s4097_s0 + $0x2f8] sm:$0xff]  }
  0x27   :  { %2672 = vmatpush3.bf16.msra.mxu0 %v3056_v52  ;;  %v3136_v52 = vld [vmem:[%s4097_s0 + $0x208] sm:$0xff]  }
  0x28   :  { %2673 = vmatprep.subr.bf16.mxu0 %v3062_v56  ;;  %v3137_v53 = vld [vmem:[%s4097_s0 + $0x2c8] sm:$0xff]  }
  0x29   :  { %2736 = vmatpush3.bf16.msra.mxu1 %v3060_v55  ;;  %v3115_v55 = vld [vmem:[%s4098_s1 + $0xe0] ss:$52 sps:$4 sm:$0xff]   ;;  %v3140_v56 = vld [vmem:[%s4097_s0 + $0x288] sm:$0xff]  }
  0x2a   :  { %1599 = vmatmul.mubr.bf16.gmra.mrb[4].mxu0 %v3029_v39  ;;  %2737 = vmatprep.subr.bf16.mxu1 %v3067_v61  ;;  %v331_v39 = vld [vmem:[%s4099_s2 + $0x10] sm:$0xff] }
  0x2b   :  { %1606 = vmatprep.mubr.bf16.mxu0 %v3033_v40  ;;  %2674 = vmatpush3.bf16.msra.mxu0 %v3065_v60  ;;  %v3104_v40 = vld [vmem:[%s4098_s1 + $0x18] ss:$52 sps:$4 sm:$0xff]   ;;  %v3118_v60 = vld [vmem:[%s4098_s1 + $0xe8] ss:$52 sps:$4 sm:$0xff]   ;;  %v3145_v61 = vld [vmem:[%s4097_s0 + $0x210] sm:$0xff]  }
  0x2c   :  { %1696 = vmatmul.mubr.bf16.gmra.mrb[4].mxu1 %v3032_v41  ;;  %2675 = vmatprep.subr.bf16.mxu0 %v3069_v63  ;;  %v3110_v41 = vld [vmem:[%s4098_s1 + $0x84] ss:$52 sps:$4 sm:$0xff]   ;;  %v3147_v63 = vld [vmem:[%s4097_s0 + $0x2d0] sm:$0xff]  }
  0x2d   :  { %1703 = vmatprep.mubr.bf16.mxu1 %v3036_v42  ;;  %2738 = vmatpush3.bf16.msra.mxu1 %v3068_v62  ;;  %v3128_v42 = vld [vmem:[%s4097_s0 + $0x240] sm:$0xff]   ;;  %v3122_v62 = vld [vmem:[%s4098_s1 + $0x154] ss:$52 sps:$4 sm:$0xff]  }
  0x2e   :  { %2739 = vmatprep.subr.bf16.mxu1 %v3071_v2  ;;  %357 = vperm.xlu1 %2988, %v331_v39   ;;  %v3150_v2 = vld [vmem:[%s4097_s0 + $0x218] sm:$0xff]  }
  0x2f   :  { %2676 = vmatpush3.bf16.msra.mxu0 %v3070_v1  ;;  %352 = vperm.xlu0 %2987, %v330_v37   ;;  %v3149_v1 = vld [vmem:[%s4097_s0 + $0x258] sm:$0xff]   ;;  %v3155_v37 = vld [vmem:[%s4098_s1 + $0x280] ss:$52 sps:$4 sm:$0xff]  }
  0x30   :  { %2677 = vmatprep.subr.bf16.mxu0 %v3076_v6  ;;  %v3124_v6 = vld [vmem:[%s4098_s1 + $0x150] ss:$52 sps:$4 sm:$0xff]   ;;  %v340_v39 = vld [vmem:[%s4099_s2 + $0x58] sm:$0xff] }
  0x31   :  { %2740 = vmatpush3.bf16.msra.mxu1 %v3074_v4  ;;  %v335_v4 = vld [vmem:[%s4099_s2 + $0x30] sm:$0xff] }
  0x32   :  { %1607 = vmatmul.mubr.bf16.gmra.mrb[8].mxu0 %v3035_v44  ;;  %2741 = vmatprep.subr.bf16.mxu1 %v3081_v10  ;;  %v3109_v44 = vld [vmem:[%s4098_s1 + $0x78] ss:$52 sps:$4 sm:$0xff]  }
  0x33   :  { %1614 = vmatprep.mubr.bf16.mxu0 %v3039_v46  ;;  %2678 = vmatpush3.bf16.msra.mxu0 %v3079_v8  ;;  %v3113_v46 = vld [vmem:[%s4098_s1 + $0xe4] ss:$52 sps:$4 sm:$0xff]  }
  0x34   :  { %1704 = vmatmul.mubr.bf16.gmra.mrb[8].mxu1 %v3038_v47  ;;  %2679 = vmatprep.subr.bf16.mxu0 %v3083_v13  ;;  %v3133_v47 = vld [vmem:[%s4097_s0 + $0x2c0] sm:$0xff]   ;;  %v3154_v8 = vld [vmem:[%s4097_s0 + $0x298] sm:$0xff]  }
  0x35   :  { %1711 = vmatprep.mubr.bf16.mxu1 %v3042_v49  ;;  %2742 = vmatpush3.bf16.msra.mxu1 %v3082_v12  ;;  %v3112_v49 = vld [vmem:[%s4098_s1 + $0x80] ss:$52 sps:$4 sm:$0xff]   ;;  %v336_v10 = vld [vmem:[%s4099_s2 + $0x38] sm:$0xff]  ;;  %v3127_v13 = vld [vmem:[%s4098_s1 + $0x1b0] ss:$52 sps:$4 sm:$0xff]  }
  0x36   :  { %2743 = vmatprep.subr.bf16.mxu1 %v3085_v15  ;;  %362 = vperm.xlu1 %2988, %v332_v43   ;;  %v3159_v12 = vld [vmem:[%s4097_s0 + $0x220] sm:$0xff]   ;;  %v3138_v15 = vld [vmem:[%s4098_s1 + $0x21c] ss:$52 sps:$4 sm:$0xff]   ;;  %v3171_v43 = vld [vmem:[%s4098_s1 + $0x2f4] ss:$52 sps:$4 sm:$0xff]  }
  0x37   :  { %2680 = vmatpush3.bf16.msra.mxu0 %v3084_v14  ;;  %v3161_v14 = vld [vmem:[%s4097_s0 + $0x2e0] sm:$0xff]  }
  0x38   :  { %2681 = vmatprep.subr.bf16.mxu0 %v3090_v19  ;;  %v3164_v19 = vld [vmem:[%s4097_s0 + $0x228] sm:$0xff]  }
  0x39   :  { %2744 = vmatpush3.bf16.msra.mxu1 %v3088_v18  ;;  %v3132_v18 = vld [vmem:[%s4098_s1 + $0x1b8] ss:$52 sps:$4 sm:$0xff]  }
  0x3a   :  { %1615 = vmatmul.mubr.bf16.gmra.mrb[12].mxu0 %v3041_v54  ;;  %2745 = vmatprep.subr.bf16.mxu1 %v3095_v24  ;;  %v333_v54 = vld [vmem:[%s4099_s2 + $0x20] sm:$0xff]  ;;  %v3170_v24 = vld [vmem:[%s4097_s0 + $0x270] sm:$0xff]  }
  0x3b   :  { %1622 = vmatprep.mubr.bf16.mxu0 %v3045_v58  ;;  %2682 = vmatpush3.bf16.msra.mxu0 %v3093_v21  ;;  %v334_v58 = vld [vmem:[%s4099_s2 + $0x28] sm:$0xff]  ;;  %v337_v21 = vld [vmem:[%s4099_s2 + $0x40] sm:$0xff] }
  0x3c   :  { %1712 = vmatmul.mubr.bf16.gmra.mrb[12].mxu1 %v3044_v57  ;;  %2683 = vmatprep.subr.bf16.mxu0 %v3097_v27  ;;  %v3142_v57 = vld [vmem:[%s4097_s0 + $0x250] sm:$0xff]   ;;  %v3152_v27 = vld [vmem:[%s4098_s1 + $0x284] ss:$52 sps:$4 sm:$0xff]  }
  0x3d   :  { %1719 = vmatprep.mubr.bf16.mxu1 %v3049_v59  ;;  %2746 = vmatpush3.bf16.msra.mxu1 %v3096_v26  ;;  %v3119_v59 = vld [vmem:[%s4098_s1 + $0x14c] ss:$52 sps:$4 sm:$0xff]  }
  0x3e   :  { %2747 = vmatprep.subr.bf16.mxu1 %v3099_v29  ;;  %367 = vperm.xlu0 %2987, %v333_v54   ;;  %v3141_v26 = vld [vmem:[%s4098_s1 + $0x218] ss:$52 sps:$4 sm:$0xff]   ;;  %v3146_v29 = vld [vmem:[%s4098_s1 + $0x220] ss:$52 sps:$4 sm:$0xff]   ;;  %v3184_v54 = vld [vmem:[%s4098_s1 + $0x28] ss:$52 sps:$4 sm:$0xff]  }
  0x3f   :  { %2684 = vmatpush3.bf16.msra.mxu0 %v3098_v28  ;;  %372 = vperm.xlu1 %2988, %v334_v58   ;;  %v3173_v28 = vld [vmem:[%s4097_s0 + $0x230] sm:$0xff]  }
  0x40   :  { %2797 = vmatprep.subr.bf16.mxu0 %v3128_v42  ;;  %v3160_v42 = vld [vmem:[%s4098_s1 + $0x288] ss:$52 sps:$4 sm:$0xff]  }
  0x41   :  { %2748 = vmatpush3.bf16.msra.mxu1 %v3103_v30  ;;  %v3175_v30 = vld [vmem:[%s4097_s0 + $0x2f0] sm:$0xff]  }
  0x42   :  { %1623 = vmatmul.mubr.bf16.gmra.mrb[16].mxu0 %v3047_v0  ;;  %2861 = vmatprep.subr.bf16.mxu1 %v3133_v47  ;;  %v3148_v0 = vld [vmem:[%s4097_s0 + $0x290] sm:$0xff]   ;;  %v3169_v47 = vld [vmem:[%s4098_s1 + $0x2e8] ss:$52 sps:$4 sm:$0xff]  }
  0x43   :  { %1630 = vmatprep.mubr.bf16.mxu0 %v3058_v3  ;;  %v3151_v3 = vld [vmem:[%s4097_s0 + $0x2d8] sm:$0xff]   ;;  %377 = vperm.xlu0 %2987, %v335_v4   ;;  %v3193_v58 = vld [vmem:[%s4098_s1 + $0xf4] ss:$52 sps:$4 sm:$0xff]  }
  0x44   :  { %1720 = vmatmul.mubr.bf16.gmra.mrb[16].mxu1 %v3052_v5  ;;  %v3121_v5 = vld [vmem:[%s4098_s1 + $0x148] ss:$52 sps:$4 sm:$0xff]   ;;  %382 = vperm.xlu1 %2988, %v336_v10   ;;  %v3205_v4 = vld [vmem:[%s4098_s1 + $0x1c4] ss:$52 sps:$4 sm:$0xff]  }
  0x45   :  { %1727 = vmatprep.mubr.bf16.mxu1 %v3063_v7  ;;  %v3125_v7 = vld [vmem:[%s4098_s1 + $0x1b4] ss:$52 sps:$4 sm:$0xff]  }
  0x46   :  { %v3215_v10 = vld [vmem:[%s4098_s1 + $0x234] ss:$52 sps:$4 sm:$0xff]  }
  0x47   :  { %387 = vperm.xlu0 %2987, %v337_v21   ;;  %v3229_v21 = vld [vmem:[%s4098_s1 + $0x300] ss:$52 sps:$4 sm:$0xff]  }
  0x4a   :  { %1631 = vmatmul.mubr.bf16.gmra.mrb[20].mxu0 %v3061_v9  ;;  %v3156_v9 = vld [vmem:[%s4097_s0 + $0x260] sm:$0xff]  }
  0x4b   :  { %1638 = vmatprep.mubr.bf16.mxu0 %v3072_v11  ;;  %v3129_v11 = vld [vmem:[%s4098_s1 + $0x1bc] ss:$52 sps:$4 sm:$0xff]  }
  0x4c   :  { %1728 = vmatmul.mubr.bf16.gmra.mrb[20].mxu1 %v3066_v16  ;;  %v3162_v16 = vld [vmem:[%s4097_s0 + $0x2a0] sm:$0xff]  }
  0x4d   :  { %1735 = vmatprep.mubr.bf16.mxu1 %v3077_v17  ;;  %v3163_v17 = vld [vmem:[%s4097_s0 + $0x268] sm:$0xff]  }
  0x52   :  { %1639 = vmatmul.mubr.bf16.gmra.mrb[24].mxu0 %v3075_v20  ;;  %v3165_v20 = vld [vmem:[%s4097_s0 + $0x2e8] sm:$0xff]  }
  0x53   :  { %1646 = vmatprep.mubr.bf16.mxu0 %v3086_v22  ;;  %v3143_v22 = vld [vmem:[%s4098_s1 + $0x224] ss:$52 sps:$4 sm:$0xff]  }
  0x54   :  { %1736 = vmatmul.mubr.bf16.gmra.mrb[24].mxu1 %v3080_v23  ;;  %v3168_v23 = vld [vmem:[%s4097_s0 + $0x2a8] sm:$0xff]  }
  0x55   :  { %1743 = vmatprep.mubr.bf16.mxu1 %v3091_v25  ;;  %v338_v25 = vld [vmem:[%s4099_s2 + $0x48] sm:$0xff] }
  0x56   :  { %392 = vperm.xlu1 %2988, %v338_v25   ;;  %v3235_v25 = vld [vmem:[%s4098_s1 + $0x1d0] ss:$52 sps:$4 sm:$0xff]  }
  0x5a   :  { %1647 = vmatmul.mubr.bf16.gmra.mrb[28].mxu0 %v3089_v31  ;;  %v3157_v31 = vld [vmem:[%s4098_s1 + $0x28c] ss:$52 sps:$4 sm:$0xff]   ;;  %402 = vperm.xlu1 %2988, %v340_v39  }
  0x5b   :  { %1784 = vmatprep.mubr.bf16.mxu0 %v3102_v32  ;;  %v3176_v32 = vld [vmem:[%s4097_s0 + $0x2b0] sm:$0xff]  }
  0x5c   :  { %1744 = vmatmul.mubr.bf16.gmra.mrb[28].mxu1 %v3094_v33  ;;  %v3177_v33 = vld [vmem:[%s4097_s0 + $0x278] sm:$0xff]  }
  0x5d   :  { %1881 = vmatprep.mubr.bf16.mxu1 %v3106_v34  ;;  %v3178_v34 = vld [vmem:[%s4097_s0 + $0x238] sm:$0xff]  }
  0x62   :  { %1785 = vmatmul.mubr.bf16.vlgmr.msra.gmra.mrb[32].mxu0 %v3100_v36  ;;  %v339_v36 = vld [vmem:[%s4099_s2 + $0x50] sm:$0xff] }
  0x63   :  { %1792 = vmatprep.mubr.bf16.mxu0 %v3107_v38  ;;  %2798 = vmatpush3.bf16.msra.mxu0 %v3131_v45  ;;  %v3183_v38 = vld [vmem:[%s4097_s0 + $0x2b8] sm:$0xff]   ;;  %v343_v45 = vld [vmem:[%s4099_s2 + $0x70] sm:$0xff] }
  0x64   :  { %1882 = vmatmul.mubr.bf16.vlgmr.msra.gmra.mrb[32].mxu1 %v3104_v40  ;;  %2799 = vmatprep.subr.bf16.mxu0 %v3135_v50  ;;  %v3166_v40 = vld [vmem:[%s4098_s1 + $0x2ec] ss:$52 sps:$4 sm:$0xff]  }
  0x65   :  { %1889 = vmatprep.mubr.bf16.mxu1 %v3110_v41  ;;  %2862 = vmatpush3.bf16.msra.mxu1 %v3134_v48  ;;  %v341_v41 = vld [vmem:[%s4099_s2 + $0x60] sm:$0xff] }
  0x66   :  { %2863 = vmatprep.subr.bf16.mxu1 %v3137_v53  ;;  %397 = vperm.xlu0 %2987, %v339_v36   ;;  %v3182_v48 = vld [vmem:[%s4098_s1 + $0x24] ss:$52 sps:$4 sm:$0xff]   ;;  %v3186_v50 = vld [vmem:[%s4098_s1 + $0x2c] ss:$52 sps:$4 sm:$0xff]  }
  0x67   :  { %2800 = vmatpush3.bf16.msra.mxu0 %v3136_v52  ;;  %v3180_v52 = vld [vmem:[%s4098_s1 + $0x20] ss:$52 sps:$4 sm:$0xff]  }
  0x68   :  { %2801 = vmatprep.subr.bf16.mxu0 %v3142_v57  ;;  %v3187_v53 = vld [vmem:[%s4098_s1 + $0x8c] ss:$52 sps:$4 sm:$0xff]  }
  0x69   :  { %2864 = vmatpush3.bf16.msra.mxu1 %v3140_v56  ;;  %v3189_v56 = vld [vmem:[%s4098_s1 + $0x88] ss:$52 sps:$4 sm:$0xff]  }
  0x6a   :  { %1793 = vmatmul.mubr.bf16.gmra.mrb[36].mxu0 %v3109_v44  ;;  %2865 = vmatprep.subr.bf16.mxu1 %v3147_v63  ;;  %v342_v44 = vld [vmem:[%s4099_s2 + $0x68] sm:$0xff] }
  0x6b   :  { %1800 = vmatprep.mubr.bf16.mxu0 %v3113_v46  ;;  %2802 = vmatpush3.bf16.msra.mxu0 %v3145_v61  ;;  %v344_v46 = vld [vmem:[%s4099_s2 + $0x78] sm:$0xff]  ;;  %v3230_v57 = vld [vmem:[%s4097_s0 + $0x308] sm:$0xff]   ;;  %v3195_v61 = vld [vmem:[%s4098_s1 + $0xf0] ss:$52 sps:$4 sm:$0xff]  }
  0x6c   :  { %1890 = vmatmul.mubr.bf16.gmra.mrb[36].mxu1 %v3112_v49  ;;  %2803 = vmatprep.subr.bf16.mxu0 %v3149_v1  ;;  %v3174_v49 = vld [vmem:[%s4098_s1 + $0x2f0] ss:$52 sps:$4 sm:$0xff]   ;;  %v2264_v63 = vld [vmem:[%s4100_s4 + $0x8] sm:$0x3]  ;;  %v3198_v1 = vld [vmem:[%s4098_s1 + $0xf8] ss:$52 sps:$4 sm:$0xff]  }
  0x6d   :  { %1897 = vmatprep.mubr.bf16.mxu1 %v3116_v51  ;;  %2866 = vmatpush3.bf16.msra.mxu1 %v3148_v0  ;;  %v3208_v51 = vld [vmem:[%s4097_s0 + $0x300] sm:$0xff]   ;;  %v3199_v0 = vld [vmem:[%s4098_s1 + $0x15c] ss:$52 sps:$4 sm:$0xff]  }
  0x6e   :  { %2867 = vmatprep.subr.bf16.mxu1 %v3151_v3  ;;  %407 = vperm.xlu0 %2987, %v341_v41   ;;  %v3201_v3 = vld [vmem:[%s4098_s1 + $0x158] ss:$52 sps:$4 sm:$0xff]  }
  0x6f   :  { %2804 = vmatpush3.bf16.msra.mxu0 %v3150_v2  ;;  %412 = vperm.xlu1 %2988, %v342_v44   ;;  %v3202_v2 = vld [vmem:[%s4098_s1 + $0x164] ss:$52 sps:$4 sm:$0xff]  }
  0x70   :  { %2805 = vmatprep.subr.bf16.mxu0 %v3156_v9  ;;  %v3211_v9 = vld [vmem:[%s4098_s1 + $0x1c8] ss:$52 sps:$4 sm:$0xff]  }
  0x71   :  { %2868 = vmatpush3.bf16.msra.mxu1 %v3154_v8  ;;  %v3212_v8 = vld [vmem:[%s4098_s1 + $0x22c] ss:$52 sps:$4 sm:$0xff]  }
  0x72   :  { %1801 = vmatmul.mubr.bf16.gmra.mrb[40].mxu0 %v3115_v55  ;;  %2869 = vmatprep.subr.bf16.mxu1 %v3161_v14  ;;  %v3190_v55 = vld [vmem:[%s4098_s1 + $0x94] ss:$52 sps:$4 sm:$0xff]   ;;  %v3221_v14 = vld [vmem:[%s4098_s1 + $0x29c] ss:$52 sps:$4 sm:$0xff]  }
  0x73   :  { %1808 = vmatprep.mubr.bf16.mxu0 %v3119_v59  ;;  %2806 = vmatpush3.bf16.msra.mxu0 %v3159_v12  ;;  %v3192_v59 = vld [vmem:[%s4098_s1 + $0x90] ss:$52 sps:$4 sm:$0xff]   ;;  %v3218_v12 = vld [vmem:[%s4098_s1 + $0x294] ss:$52 sps:$4 sm:$0xff]  }
  0x74   :  { %1898 = vmatmul.mubr.bf16.gmra.mrb[40].mxu1 %v3118_v60  ;;  %2807 = vmatprep.subr.bf16.mxu0 %v3163_v17  ;;  %v3196_v60 = vld [vmem:[%s4098_s1 + $0xfc] ss:$52 sps:$4 sm:$0xff]   ;;  %v3223_v17 = vld [vmem:[%s4098_s1 + $0x298] ss:$52 sps:$4 sm:$0xff]  }
  0x75   :  { %1905 = vmatprep.mubr.bf16.mxu1 %v3122_v62  ;;  %2870 = vmatpush3.bf16.msra.mxu1 %v3162_v16  ;;  %v2263_v62 = vld [vmem:[%s4100_s4] sm:$0xff]  ;;  %v3224_v16 = vld [vmem:[%s4098_s1 + $0x2fc] ss:$52 sps:$4 sm:$0xff]  }
  0x76   :  { %2871 = vmatprep.subr.bf16.mxu1 %v3165_v20  ;;  %417 = vperm.xlu0 %2987, %v343_v45   ;;  %v3231_v20 = vld [vmem:[%s4098_s1 + $0x30] ss:$52 sps:$4 sm:$0xff]  }
  0x77   :  { %2808 = vmatpush3.bf16.msra.mxu0 %v3164_v19  ;;  %422 = vperm.xlu1 %2988, %v344_v46   ;;  %v3226_v19 = vld [vmem:[%s4098_s1 + $0x2f8] ss:$52 sps:$4 sm:$0xff]  }
  0x78   :  { %2809 = vmatprep.subr.bf16.mxu0 %v3170_v24  ;;  %v3234_v24 = vld [vmem:[%s4098_s1 + $0x168] ss:$52 sps:$4 sm:$0xff]  }
  0x79   :  { %2872 = vmatpush3.bf16.msra.mxu1 %v3168_v23  ;;  %v3233_v23 = vld [vmem:[%s4098_s1 + $0x100] ss:$52 sps:$4 sm:$0xff]  }
  0x7a   :  { %1809 = vmatmul.mubr.bf16.gmra.mrb[44].mxu0 %v3121_v5  ;;  %2873 = vmatprep.subr.bf16.mxu1 %v3175_v30  ;;  %v3204_v5 = vld [vmem:[%s4098_s1 + $0x160] ss:$52 sps:$4 sm:$0xff]  }
  0x7b   :  { %1816 = vmatprep.mubr.bf16.mxu0 %v3125_v7  ;;  %2810 = vmatpush3.bf16.msra.mxu0 %v3173_v28  ;;  %v3207_v7 = vld [vmem:[%s4098_s1 + $0x1c0] ss:$52 sps:$4 sm:$0xff]  }
  0x7c   :  { %1906 = vmatmul.mubr.bf16.gmra.mrb[44].mxu1 %v3124_v6  ;;  %2811 = vmatprep.subr.bf16.mxu0 %v3177_v33  ;;  %v3209_v6 = vld [vmem:[%s4098_s1 + $0x1cc] ss:$52 sps:$4 sm:$0xff]  }
  0x7d   :  { %1913 = vmatprep.mubr.bf16.mxu1 %v3129_v11  ;;  %2874 = vmatpush3.bf16.msra.mxu1 %v3176_v32  ;;  %v3214_v11 = vld [vmem:[%s4098_s1 + $0x228] ss:$52 sps:$4 sm:$0xff]  }
  0x7e   :  { %2875 = vmatprep.subr.bf16.mxu1 %v3179_v35  ;;  %2267 = vperm.xlu0 %2987, %v2263_v62  }
  0x7f   :  { %2812 = vmatpush3.bf16.msra.mxu0 %v3178_v34  ;;  %2272 = vperm.xlu1 %2988, %v2264_v63  }
  0x80   :  { %2944 = vmatprep.subr.bf16.mxu0 %v3208_v51 }
  0x81   :  { %2876 = vmatpush3.bf16.msra.mxu1 %v3183_v38 }
  0x82   :  { %1817 = vmatmul.mubr.bf16.gmra.mrb[48].mxu0 %v3127_v13  ;;  %v3217_v13 = vld [vmem:[%s4098_s1 + $0x230] ss:$52 sps:$4 sm:$0xff]  }
  0x83   :  { %1824 = vmatprep.mubr.bf16.mxu0 %v3138_v15  ;;  %v3220_v15 = vld [vmem:[%s4098_s1 + $0x290] ss:$52 sps:$4 sm:$0xff]  }
  0x84   :  { %1914 = vmatmul.mubr.bf16.gmra.mrb[48].mxu1 %v3132_v18  ;;  %v3227_v18 = vld [vmem:[%s4098_s1 + $0x304] ss:$52 sps:$4 sm:$0xff]  }
  0x85   :  { %1921 = vmatprep.mubr.bf16.mxu1 %v3143_v22  ;;  %v3232_v22 = vld [vmem:[%s4098_s1 + $0x98] ss:$52 sps:$4 sm:$0xff]  }
  0x8a   :  { %1825 = vmatmul.mubr.bf16.gmra.mrb[52].mxu0 %v3141_v26  ;;  %v3236_v26 = vld [vmem:[%s4098_s1 + $0x238] ss:$52 sps:$4 sm:$0xff]  }
  0x8b   :  { %1832 = vmatprep.mubr.bf16.mxu0 %v3152_v27  ;;  %v3237_v27 = vld [vmem:[%s4098_s1 + $0x2a0] ss:$52 sps:$4 sm:$0xff]  }
  0x8c   :  { %1922 = vmatmul.mubr.bf16.gmra.mrb[52].mxu1 %v3146_v29 }
  0x8d   :  { %1929 = vmatprep.mubr.bf16.mxu1 %v3157_v31  ;;  %v3238_v31 = vld [vmem:[%s4098_s1 + $0x308] ss:$52 sps:$4 sm:$0xff]  }
  0x92   :  { %1833 = vmatmul.mubr.bf16.gmra.mrb[56].mxu0 %v3155_v37 }
  0x93   :  { %1840 = vmatprep.mubr.bf16.mxu0 %v3166_v40 }
  0x94   :  { %1930 = vmatmul.mubr.bf16.gmra.mrb[56].mxu1 %v3160_v42 }
  0x95   :  { %1937 = vmatprep.mubr.bf16.mxu1 %v3171_v43 }
  0x9a   :  { %1841 = vmatmul.mubr.bf16.gmra.mrb[60].mxu0 %v3169_v47 }
  0x9b   :  { %1978 = vmatprep.mubr.bf16.mxu0 %v3182_v48 }
  0x9c   :  { %1938 = vmatmul.mubr.bf16.gmra.mrb[60].mxu1 %v3174_v49 }
  0x9d   :  { %2075 = vmatprep.mubr.bf16.mxu1 %v3186_v50 }
  0xa2   :  { %1979 = vmatmul.mubr.bf16.vlgmr.msra.gmra.mrb[64].mxu0 %v3180_v52 }
  0xa3   :  { %1986 = vmatprep.mubr.bf16.mxu0 %v3187_v53  ;;  %2945 = vmatpush3.bf16.msra.mxu0 %v3208_v51 }
  0xa4   :  { %2076 = vmatmul.mubr.bf16.vlgmr.msra.gmra.mrb[64].mxu1 %v3184_v54  ;;  %2946 = vmatprep.subr.bf16.mxu0 %v3230_v57 }
  0xa5   :  { %2083 = vmatprep.mubr.bf16.mxu1 %v3190_v55  ;;  %v348_v28 = vpop.permute.xlu0 %347 }
  0xa7   :  { %2947 = vmatpush3.bf16.msra.mxu0 %v3230_v57 }
  0xaa   :  { %1987 = vmatmul.mubr.bf16.gmra.mrb[68].mxu0 %v3189_v56 }
  0xab   :  { %1994 = vmatprep.mubr.bf16.mxu0 %v3193_v58 }
  0xac   :  { %2084 = vmatmul.mubr.bf16.gmra.mrb[68].mxu1 %v3192_v59 }
  0xad   :  { %2091 = vmatprep.mubr.bf16.mxu1 %v3196_v60  ;;  %v358_v40 = vpop.permute.xlu1 %357 }
  0xae   :  { %v353_v34 = vpop.permute.xlu0 %352 }
  0xb2   :  { %1995 = vmatmul.mubr.bf16.gmra.mrb[72].mxu0 %v3195_v61 }
  0xb3   :  { %2002 = vmatprep.mubr.bf16.mxu0 %v3199_v0 }
  0xb4   :  { %2092 = vmatmul.mubr.bf16.gmra.mrb[72].mxu1 %v3198_v1 }
  0xb5   :  { %2099 = vmatprep.mubr.bf16.mxu1 %v3202_v2  ;;  %v363_v52 = vpop.permute.xlu1 %362 }
  0xba   :  { %2003 = vmatmul.mubr.bf16.gmra.mrb[76].mxu0 %v3201_v3 }
  0xbb   :  { %2010 = vmatprep.mubr.bf16.mxu0 %v3205_v4 }
  0xbc   :  { %2100 = vmatmul.mubr.bf16.gmra.mrb[76].mxu1 %v3204_v5 }
  0xbd   :  { %2107 = vmatprep.mubr.bf16.mxu1 %v3209_v6  ;;  %v368_v3 = vpop.permute.xlu0 %367 }
  0xbe   :  { %v373_v6 = vpop.permute.xlu1 %372 }
  0xc2   :  { %2011 = vmatmul.mubr.bf16.gmra.mrb[80].mxu0 %v3207_v7 }
  0xc3   :  { %2018 = vmatprep.mubr.bf16.mxu0 %v3212_v8 }
  0xc4   :  { %2108 = vmatmul.mubr.bf16.gmra.mrb[80].mxu1 %v3211_v9 }
  0xc5   :  { %2115 = vmatprep.mubr.bf16.mxu1 %v3215_v10 }
  0xca   :  { %2019 = vmatmul.mubr.bf16.gmra.mrb[84].mxu0 %v3214_v11 }
  0xcb   :  { %2026 = vmatprep.mubr.bf16.mxu0 %v3218_v12 }
  0xcc   :  { %2116 = vmatmul.mubr.bf16.gmra.mrb[84].mxu1 %v3217_v13 }
  0xcd   :  { %2123 = vmatprep.mubr.bf16.mxu1 %v3221_v14 }
  0xd2   :  { %2027 = vmatmul.mubr.bf16.gmra.mrb[88].mxu0 %v3220_v15 }
  0xd3   :  { %2034 = vmatprep.mubr.bf16.mxu0 %v3224_v16 }
  0xd4   :  { %2124 = vmatmul.mubr.bf16.gmra.mrb[88].mxu1 %v3223_v17 }
  0xd5   :  { %2131 = vmatprep.mubr.bf16.mxu1 %v3227_v18 }
  0xda   :  { %2035 = vmatmul.mubr.bf16.gmra.mrb[92].mxu0 %v3226_v19 }
  0xdb   :  { %2948 = vmatprep.mubr.msk.bf16.mxu0 %vm1533_vm0, %v3231_v20 }
  0xdc   :  { %2132 = vmatmul.mubr.bf16.gmra.mrb[92].mxu1 %v3229_v21  ;;  %v378_v21 = vpop.permute.xlu0 %377 }
  0xe2   :  { %2949 = vmatmul.mubr.msk.bf16.vlgmr.msra.gmra.mrb[96].mxu0 %vm1533_vm0, %v3232_v22 }
  0xe3   :  { %2952 = vmatprep.mubr.msk.bf16.mxu0 %vm1533_vm0, %v3233_v23 }
  0xea   :  { %2953 = vmatmul.mubr.msk.bf16.gmra.mrb[100].mxu0 %vm1533_vm0, %v3234_v24  ;;  %v383_v24 = vpop.permute.xlu1 %382 }
  0xeb   :  { %2956 = vmatprep.mubr.msk.bf16.mxu0 %vm1533_vm0, %v3235_v25 }
  0xf2   :  { %2957 = vmatmul.mubr.msk.bf16.gmra.mrb[104].mxu0 %vm1533_vm0, %v3236_v26 }
  0xf3   :  { %2960 = vmatprep.mubr.msk.bf16.mxu0 %vm1533_vm0, %v3237_v27 }
  0xf5   :  { %v2557_v29 = vpop.f32.mrb[0].mxu0 }
  0xf6   :  { %v2558_v30 = vpop.f32.mrb[1].mxu0 }
  0xf7   :  { %v2559_v32 = vadd.f32 %v2558_v30, %v2557_v29  ;;  %v2560_v33 = vpop.f32.mrb[2].mxu0  ;;  %v2621_v35 = vpop.f32.mrb[0].mxu1 }
  0xf8   :  { %v2561_v36 = vpop.f32.mrb[3].mxu0  ;;  %v2622_v39 = vpop.f32.mrb[1].mxu1 }
  0xf9   :  { %v1593_v37 = vadd.f32 %v2559_v32, %v348_v28  ;;  %v2562_v38 = vadd.f32 %v2561_v36, %v2560_v33  ;;  %v2623_v41 = vadd.f32 %v2622_v39, %v2621_v35  ;;  %v2624_v42 = vpop.f32.mrb[2].mxu1  ;;  %v388_v39 = vpop.permute.xlu0 %387 }
  0xfa   :  { %2961 = vmatmul.mubr.msk.bf16.gmra.mrb[108].mxu0 %vm1533_vm0, %v3238_v31  ;;  %v2625_v44 = vpop.f32.mrb[3].mxu1 }
  0xfb   :  { %v1596_v43 = vadd.f32 %v2562_v38, %v353_v34  ;;  %v3941_v45 = vadd.f32 %v2623_v41, %v1593_v37  ;;  %v2626_v46 = vadd.f32 %v2625_v44, %v2624_v42  ;;  %v393_v42 = vpop.permute.xlu1 %392 }
  0xfd   :  { %v2563_v47 = vpop.f32.mrb[4].mxu0  ;;  %v3943_v48 = vadd.f32 %v2626_v46, %v1596_v43 }
  0xfe   :  { %v2564_v49 = vpop.f32.mrb[5].mxu0 }
  0xff   :  { %v2565_v50 = vadd.f32 %v2564_v49, %v2563_v47  ;;  %v2566_v51 = vpop.f32.mrb[6].mxu0  ;;  %v2627_v53 = vpop.f32.mrb[4].mxu1 }
 0x100   :  { %v2567_v54 = vpop.f32.mrb[7].mxu0  ;;  %v2628_v57 = vpop.f32.mrb[5].mxu1 }
 0x101   :  { %v1601_v55 = vadd.f32 %v2565_v50, %v358_v40  ;;  %v2568_v56 = vadd.f32 %v2567_v54, %v2566_v51  ;;  %v2629_v58 = vadd.f32 %v2628_v57, %v2627_v53  ;;  %v2630_v59 = vpop.f32.mrb[6].mxu1 }
 0x102   :  { %v2631_v61 = vpop.f32.mrb[7].mxu1 }
 0x103   :  { %v1604_v60 = vadd.f32 %v2568_v56, %v363_v52  ;;  %v3945_v62 = vadd.f32 %v2629_v58, %v1601_v55  ;;  %v2632_v63 = vadd.f32 %v2631_v61, %v2630_v59  ;;  %v398_v59 = vpop.permute.xlu0 %397 }
 0x105   :  { %v2569_v0 = vpop.f32.mrb[8].mxu0  ;;  %v3947_v1 = vadd.f32 %v2632_v63, %v1604_v60  ;;  %v403_v63 = vpop.permute.xlu1 %402 }
 0x106   :  { %v2570_v2 = vpop.f32.mrb[9].mxu0 }
 0x107   :  { %v2571_v4 = vadd.f32 %v2570_v2, %v2569_v0  ;;  %v2572_v5 = vpop.f32.mrb[10].mxu0  ;;  %v2633_v7 = vpop.f32.mrb[8].mxu1 }
 0x108   :  { %v2573_v8 = vpop.f32.mrb[11].mxu0  ;;  %v2634_v11 = vpop.f32.mrb[9].mxu1 }
 0x109   :  { %v1609_v9 = vadd.f32 %v2571_v4, %v368_v3  ;;  %v2574_v10 = vadd.f32 %v2573_v8, %v2572_v5  ;;  %v2635_v12 = vadd.f32 %v2634_v11, %v2633_v7  ;;  %v2636_v13 = vpop.f32.mrb[10].mxu1 }
 0x10a   :  { %v2637_v15 = vpop.f32.mrb[11].mxu1 }
 0x10b   :  { %v1612_v14 = vadd.f32 %v2574_v10, %v373_v6  ;;  %v3949_v16 = vadd.f32 %v2635_v12, %v1609_v9  ;;  %v2638_v17 = vadd.f32 %v2637_v15, %v2636_v13  ;;  %v408_v15 = vpop.permute.xlu0 %407 }
 0x10d   :  { %v2575_v18 = vpop.f32.mrb[12].mxu0  ;;  %v3951_v19 = vadd.f32 %v2638_v17, %v1612_v14 }
 0x10e   :  { %v2576_v20 = vpop.f32.mrb[13].mxu0 }
 0x10f   :  { %v2577_v22 = vadd.f32 %v2576_v20, %v2575_v18  ;;  %v2578_v23 = vpop.f32.mrb[14].mxu0  ;;  %v2639_v25 = vpop.f32.mrb[12].mxu1 }
 0x110   :  { %v2579_v26 = vpop.f32.mrb[15].mxu0  ;;  %v2640_v29 = vpop.f32.mrb[13].mxu1 }
 0x111   :  { %v1617_v27 = vadd.f32 %v2577_v22, %v378_v21  ;;  %v2580_v28 = vadd.f32 %v2579_v26, %v2578_v23  ;;  %v2641_v30 = vadd.f32 %v2640_v29, %v2639_v25  ;;  %v2642_v31 = vpop.f32.mrb[14].mxu1  ;;  %v413_v20 = vpop.permute.xlu1 %412 }
 0x112   :  { %v2643_v33 = vpop.f32.mrb[15].mxu1 }
 0x113   :  { %v1620_v32 = vadd.f32 %v2580_v28, %v383_v24  ;;  %v3953_v34 = vadd.f32 %v2641_v30, %v1617_v27  ;;  %v2644_v35 = vadd.f32 %v2643_v33, %v2642_v31 }
 0x115   :  { %v2581_v36 = vpop.f32.mrb[16].mxu0  ;;  %v3955_v37 = vadd.f32 %v2644_v35, %v1620_v32 }
 0x116   :  { %v2582_v38 = vpop.f32.mrb[17].mxu0 }
 0x117   :  { %v2583_v40 = vadd.f32 %v2582_v38, %v2581_v36  ;;  %v2584_v41 = vpop.f32.mrb[18].mxu0  ;;  %v2645_v43 = vpop.f32.mrb[16].mxu1 }
 0x118   :  { %v2585_v44 = vpop.f32.mrb[19].mxu0  ;;  %v2646_v49 = vpop.f32.mrb[17].mxu1 }
 0x119   :  { %v1625_v46 = vadd.f32 %v2583_v40, %v388_v39  ;;  %v2586_v47 = vadd.f32 %v2585_v44, %v2584_v41  ;;  %v2647_v50 = vadd.f32 %v2646_v49, %v2645_v43  ;;  %v2648_v51 = vpop.f32.mrb[18].mxu1  ;;  %v418_v36 = vpop.permute.xlu0 %417 }
 0x11a   :  { %v2649_v53 = vpop.f32.mrb[19].mxu1  ;;  %v423_v40 = vpop.permute.xlu1 %422 }
 0x11b   :  { %v1628_v52 = vadd.f32 %v2586_v47, %v393_v42  ;;  %v3957_v54 = vadd.f32 %v2647_v50, %v1625_v46  ;;  %v2650_v55 = vadd.f32 %v2649_v53, %v2648_v51 }
 0x11d   :  { %v2587_v56 = vpop.f32.mrb[20].mxu0  ;;  %v3959_v57 = vadd.f32 %v2650_v55, %v1628_v52 }
 0x11e   :  { %v2588_v58 = vpop.f32.mrb[21].mxu0 }
 0x11f   :  { %v2589_v60 = vadd.f32 %v2588_v58, %v2587_v56  ;;  %v2590_v61 = vpop.f32.mrb[22].mxu0  ;;  %v2651_v0 = vpop.f32.mrb[20].mxu1 }
 0x120   :  { %v2591_v2 = vpop.f32.mrb[23].mxu0  ;;  %v2652_v5 = vpop.f32.mrb[21].mxu1 }
 0x121   :  { %v1633_v3 = vadd.f32 %v2589_v60, %v398_v59  ;;  %v2592_v4 = vadd.f32 %v2591_v2, %v2590_v61  ;;  %v2653_v6 = vadd.f32 %v2652_v5, %v2651_v0  ;;  %v2654_v7 = vpop.f32.mrb[22].mxu1 }
 0x122   :  { %v2655_v9 = vpop.f32.mrb[23].mxu1 }
 0x123   :  { %v1636_v8 = vadd.f32 %v2592_v4, %v403_v63  ;;  %v3961_v10 = vadd.f32 %v2653_v6, %v1633_v3  ;;  %v2656_v11 = vadd.f32 %v2655_v9, %v2654_v7 }
 0x125   :  { %v2593_v12 = vpop.f32.mrb[24].mxu0  ;;  %v3963_v13 = vadd.f32 %v2656_v11, %v1636_v8 }
 0x126   :  { %v2594_v14 = vpop.f32.mrb[25].mxu0 }
 0x127   :  { %v2595_v17 = vadd.f32 %v2594_v14, %v2593_v12  ;;  %v2596_v18 = vpop.f32.mrb[26].mxu0  ;;  %v2657_v21 = vpop.f32.mrb[24].mxu1 }
 0x128   :  { %v2597_v22 = vpop.f32.mrb[27].mxu0  ;;  %v2658_v25 = vpop.f32.mrb[25].mxu1 }
 0x129   :  { %v1641_v23 = vadd.f32 %v2595_v17, %v408_v15  ;;  %v2598_v24 = vadd.f32 %v2597_v22, %v2596_v18  ;;  %v2659_v26 = vadd.f32 %v2658_v25, %v2657_v21  ;;  %v2660_v27 = vpop.f32.mrb[26].mxu1  ;;  %v3241_v18 = vmov 0.0  }
 0x12a   :  { %v2661_v29 = vpop.f32.mrb[27].mxu1  ;;  %2964 = vmatprep.subr.bf16.mxu1 %v3241_v18  ;;  %2980 = vmatprep.mubr.msk.bf16.mxu1 %vm3242_vm1, %v3241_v18 }
 0x12b   :  { %v1644_v28 = vadd.f32 %v2598_v24, %v413_v20  ;;  %v3965_v30 = vadd.f32 %v2659_v26, %v1641_v23  ;;  %v2662_v31 = vadd.f32 %v2661_v29, %v2660_v27 }
 0x12d   :  { %v2599_v32 = vpop.f32.mrb[28].mxu0  ;;  %v3967_v33 = vadd.f32 %v2662_v31, %v1644_v28 }
 0x12e   :  { %v2600_v35 = vpop.f32.mrb[29].mxu0 }
 0x12f   :  { %v2601_v38 = vadd.f32 %v2600_v35, %v2599_v32  ;;  %v2602_v39 = vpop.f32.mrb[30].mxu0  ;;  %v2663_v41 = vpop.f32.mrb[28].mxu1 }
 0x130   :  { %v2603_v42 = vpop.f32.mrb[31].mxu0  ;;  %v2664_v46 = vpop.f32.mrb[29].mxu1 }
 0x131   :  { %v1649_v43 = vadd.f32 %v2601_v38, %v418_v36  ;;  %v2604_v44 = vadd.f32 %v2603_v42, %v2602_v39  ;;  %v2665_v47 = vadd.f32 %v2664_v46, %v2663_v41  ;;  %v2666_v49 = vpop.f32.mrb[30].mxu1 }
 0x132   :  { %v2667_v51 = vpop.f32.mrb[31].mxu1 }
 0x133   :  { %v1652_v50 = vadd.f32 %v2604_v44, %v423_v40  ;;  %v3969_v52 = vadd.f32 %v2665_v47, %v1649_v43  ;;  %v2668_v53 = vadd.f32 %v2667_v51, %v2666_v49 }
 0x135   :  { %v2685_v55 = vpop.f32.mrb[32].mxu0  ;;  %v3971_v56 = vadd.f32 %v2668_v53, %v1652_v50 }
 0x136   :  { %v2686_v58 = vpop.f32.mrb[33].mxu0 }
 0x137   :  { %v2687_v59 = vadd.f32 %v2686_v58, %v2685_v55  ;;  %v2688_v60 = vpop.f32.mrb[34].mxu0  ;;  %v2749_v61 = vpop.f32.mrb[32].mxu1 }
 0x138   :  { %v2689_v63 = vpop.f32.mrb[35].mxu0  ;;  %v2750_v3 = vpop.f32.mrb[33].mxu1 }
 0x139   :  { %v1787_v0 = vadd.f32 %v2687_v59, %v3941_v45  ;;  %v2690_v2 = vadd.f32 %v2689_v63, %v2688_v60  ;;  %v2751_v4 = vadd.f32 %v2750_v3, %v2749_v61  ;;  %v2752_v5 = vpop.f32.mrb[34].mxu1 }
 0x13a   :  { %v2753_v7 = vpop.f32.mrb[35].mxu1 }
 0x13b   :  { %v1790_v6 = vadd.f32 %v2690_v2, %v3943_v48  ;;  %v3975_v8 = vadd.f32 %v2751_v4, %v1787_v0  ;;  %v2754_v9 = vadd.f32 %v2753_v7, %v2752_v5 }
 0x13d   :  { %v2691_v11 = vpop.f32.mrb[36].mxu0  ;;  %v3977_v12 = vadd.f32 %v2754_v9, %v1790_v6 }
 0x13e   :  { %v2692_v14 = vpop.f32.mrb[37].mxu0 }
 0x13f   :  { %v2693_v15 = vadd.f32 %v2692_v14, %v2691_v11  ;;  %v2694_v17 = vpop.f32.mrb[38].mxu0  ;;  %v2755_v45 = vpop.f32.mrb[36].mxu1 }
 0x140   :  { %v2695_v20 = vpop.f32.mrb[39].mxu0  ;;  %v2756_v23 = vpop.f32.mrb[37].mxu1 }
 0x141   :  { %v1795_v21 = vadd.f32 %v2693_v15, %v3945_v62  ;;  %v2696_v22 = vadd.f32 %v2695_v20, %v2694_v17  ;;  %v2757_v48 = vadd.f32 %v2756_v23, %v2755_v45  ;;  %v2758_v24 = vpop.f32.mrb[38].mxu1 }
 0x142   :  { %v2759_v26 = vpop.f32.mrb[39].mxu1 }
 0x143   :  { %v1798_v25 = vadd.f32 %v2696_v22, %v3947_v1  ;;  %v3982_v27 = vadd.f32 %v2757_v48, %v1795_v21  ;;  %v2760_v28 = vadd.f32 %v2759_v26, %v2758_v24 }
 0x145   :  { %v2697_v29 = vpop.f32.mrb[40].mxu0  ;;  %v3984_v31 = vadd.f32 %v2760_v28, %v1798_v25 }
 0x146   :  { %v2698_v32 = vpop.f32.mrb[41].mxu0 }
 0x147   :  { %v2699_v35 = vadd.f32 %v2698_v32, %v2697_v29  ;;  %v2700_v36 = vpop.f32.mrb[42].mxu0  ;;  %v2761_v38 = vpop.f32.mrb[40].mxu1 }
 0x148   :  { %v2701_v39 = vpop.f32.mrb[43].mxu0  ;;  %v2762_v41 = vpop.f32.mrb[41].mxu1 }
 0x149   :  { %v1803_v62 = vadd.f32 %v2699_v35, %v3949_v16  ;;  %v2702_v40 = vadd.f32 %v2701_v39, %v2700_v36  ;;  %v2763_v42 = vadd.f32 %v2762_v41, %v2761_v38  ;;  %v2764_v43 = vpop.f32.mrb[42].mxu1 }
 0x14a   :  { %v2765_v44 = vpop.f32.mrb[43].mxu1 }
 0x14b   :  { %v1806_v1 = vadd.f32 %v2702_v40, %v3951_v19  ;;  %v3988_v46 = vadd.f32 %v2763_v42, %v1803_v62  ;;  %v2766_v47 = vadd.f32 %v2765_v44, %v2764_v43 }
 0x14d   :  { %v2703_v49 = vpop.f32.mrb[44].mxu0  ;;  %v3990_v50 = vadd.f32 %v2766_v47, %v1806_v1 }
 0x14e   :  { %v2704_v51 = vpop.f32.mrb[45].mxu0 }
 0x14f   :  { %v2705_v53 = vadd.f32 %v2704_v51, %v2703_v49  ;;  %v2706_v55 = vpop.f32.mrb[46].mxu0  ;;  %v2767_v58 = vpop.f32.mrb[44].mxu1 }
 0x150   :  { %v2707_v59 = vpop.f32.mrb[47].mxu0  ;;  %v2768_v61 = vpop.f32.mrb[45].mxu1 }
 0x151   :  { %v1811_v16 = vadd.f32 %v2705_v53, %v3953_v34  ;;  %v2708_v60 = vadd.f32 %v2707_v59, %v2706_v55  ;;  %v2769_v63 = vadd.f32 %v2768_v61, %v2767_v58  ;;  %v2770_v0 = vpop.f32.mrb[46].mxu1 }
 0x152   :  { %v2771_v2 = vpop.f32.mrb[47].mxu1 }
 0x153   :  { %v1814_v19 = vadd.f32 %v2708_v60, %v3955_v37  ;;  %v3994_v3 = vadd.f32 %v2769_v63, %v1811_v16  ;;  %v2772_v4 = vadd.f32 %v2771_v2, %v2770_v0 }
 0x155   :  { %v2709_v5 = vpop.f32.mrb[48].mxu0  ;;  %v3996_v6 = vadd.f32 %v2772_v4, %v1814_v19 }
 0x156   :  { %v2710_v7 = vpop.f32.mrb[49].mxu0 }
 0x157   :  { %v2711_v9 = vadd.f32 %v2710_v7, %v2709_v5  ;;  %v2712_v11 = vpop.f32.mrb[50].mxu0  ;;  %v2773_v14 = vpop.f32.mrb[48].mxu1 }
 0x158   :  { %v2713_v15 = vpop.f32.mrb[51].mxu0  ;;  %v2774_v45 = vpop.f32.mrb[49].mxu1 }
 0x159   :  { %v1819_v34 = vadd.f32 %v2711_v9, %v3957_v54  ;;  %v2714_v17 = vadd.f32 %v2713_v15, %v2712_v11  ;;  %v2775_v20 = vadd.f32 %v2774_v45, %v2773_v14  ;;  %v2776_v21 = vpop.f32.mrb[50].mxu1 }
 0x15a   :  { %v2777_v22 = vpop.f32.mrb[51].mxu1 }
 0x15b   :  { %v1822_v37 = vadd.f32 %v2714_v17, %v3959_v57  ;;  %v4000_v23 = vadd.f32 %v2775_v20, %v1819_v34  ;;  %v2778_v48 = vadd.f32 %v2777_v22, %v2776_v21 }
 0x15d   :  { %v2715_v24 = vpop.f32.mrb[52].mxu0  ;;  %v4003_v25 = vadd.f32 %v2778_v48, %v1822_v37 }
 0x15e   :  { %v2716_v26 = vpop.f32.mrb[53].mxu0 }
 0x15f   :  { %v2717_v28 = vadd.f32 %v2716_v26, %v2715_v24  ;;  %v2718_v29 = vpop.f32.mrb[54].mxu0  ;;  %v2779_v54 = vpop.f32.mrb[52].mxu1 }
 0x160   :  { %v2719_v32 = vpop.f32.mrb[55].mxu0  ;;  %v2780_v38 = vpop.f32.mrb[53].mxu1 }
 0x161   :  { %v1827_v35 = vadd.f32 %v2717_v28, %v3961_v10  ;;  %v2720_v36 = vadd.f32 %v2719_v32, %v2718_v29  ;;  %v2781_v57 = vadd.f32 %v2780_v38, %v2779_v54  ;;  %v2782_v39 = vpop.f32.mrb[54].mxu1 }
 0x162   :  { %v2783_v40 = vpop.f32.mrb[55].mxu1 }
 0x163   :  { %v1830_v62 = vadd.f32 %v2720_v36, %v3963_v13  ;;  %v4007_v41 = vadd.f32 %v2781_v57, %v1827_v35  ;;  %v2784_v42 = vadd.f32 %v2783_v40, %v2782_v39 }
 0x165   :  { %v2721_v43 = vpop.f32.mrb[56].mxu0  ;;  %v4009_v1 = vadd.f32 %v2784_v42, %v1830_v62 }
 0x166   :  { %v2722_v44 = vpop.f32.mrb[57].mxu0 }
 0x167   :  { %v2723_v47 = vadd.f32 %v2722_v44, %v2721_v43  ;;  %v2724_v49 = vpop.f32.mrb[58].mxu0  ;;  %v2785_v51 = vpop.f32.mrb[56].mxu1 }
 0x168   :  { %v2725_v53 = vpop.f32.mrb[59].mxu0  ;;  %v2786_v58 = vpop.f32.mrb[57].mxu1 }
 0x169   :  { %v1835_v10 = vadd.f32 %v2723_v47, %v3965_v30  ;;  %v2726_v55 = vadd.f32 %v2725_v53, %v2724_v49  ;;  %v2787_v59 = vadd.f32 %v2786_v58, %v2785_v51  ;;  %v2788_v16 = vpop.f32.mrb[58].mxu1 }
 0x16a   :  { %v2789_v60 = vpop.f32.mrb[59].mxu1 }
 0x16b   :  { %v1838_v13 = vadd.f32 %v2726_v55, %v3967_v33  ;;  %v4013_v61 = vadd.f32 %v2787_v59, %v1835_v10  ;;  %v2790_v63 = vadd.f32 %v2789_v60, %v2788_v16 }
 0x16d   :  { %v2727_v0 = vpop.f32.mrb[60].mxu0  ;;  %v4015_v19 = vadd.f32 %v2790_v63, %v1838_v13 }
 0x16e   :  { %v2728_v2 = vpop.f32.mrb[61].mxu0 }
 0x16f   :  { %v2729_v4 = vadd.f32 %v2728_v2, %v2727_v0  ;;  %v2730_v5 = vpop.f32.mrb[62].mxu0  ;;  %v2791_v7 = vpop.f32.mrb[60].mxu1 }
 0x170   :  { %v2731_v9 = vpop.f32.mrb[63].mxu0  ;;  %v2792_v14 = vpop.f32.mrb[61].mxu1 }
 0x171   :  { %v1843_v30 = vadd.f32 %v2729_v4, %v3969_v52  ;;  %v2732_v11 = vadd.f32 %v2731_v9, %v2730_v5  ;;  %v2793_v15 = vadd.f32 %v2792_v14, %v2791_v7  ;;  %v2794_v34 = vpop.f32.mrb[62].mxu1 }
 0x172   :  { %v2795_v17 = vpop.f32.mrb[63].mxu1 }
 0x173   :  { %v1846_v33 = vadd.f32 %v2732_v11, %v3971_v56  ;;  %v4019_v45 = vadd.f32 %v2793_v15, %v1843_v30  ;;  %v2796_v20 = vadd.f32 %v2795_v17, %v2794_v34 }
 0x175   :  { %v2813_v21 = vpop.f32.mrb[64].mxu0  ;;  %v4021_v37 = vadd.f32 %v2796_v20, %v1846_v33 }
 0x176   :  { %v2814_v22 = vpop.f32.mrb[65].mxu0 }
 0x177   :  { %v2815_v48 = vadd.f32 %v2814_v22, %v2813_v21  ;;  %v2816_v24 = vpop.f32.mrb[66].mxu0  ;;  %v2877_v26 = vpop.f32.mrb[64].mxu1 }
 0x178   :  { %v2817_v28 = vpop.f32.mrb[67].mxu0  ;;  %v2878_v54 = vpop.f32.mrb[65].mxu1 }
 0x179   :  { %v1981_v52 = vadd.f32 %v2815_v48, %v3975_v8  ;;  %v2818_v29 = vadd.f32 %v2817_v28, %v2816_v24  ;;  %v2879_v32 = vadd.f32 %v2878_v54, %v2877_v26  ;;  %v2880_v35 = vpop.f32.mrb[66].mxu1 }
 0x17a   :  { %v2881_v36 = vpop.f32.mrb[67].mxu1 }
 0x17b   :  { %v1984_v56 = vadd.f32 %v2818_v29, %v3977_v12  ;;  %v2882_v38 = vadd.f32 %v2881_v36, %v2880_v35  ;;  %v4025_v57 = vadd.f32 %v2879_v32, %v1981_v52 }
 0x17d   :  { %v2819_v39 = vpop.f32.mrb[68].mxu0  ;;  %v4027_v40 = vadd.f32 %v2882_v38, %v1984_v56 }
 0x17e   :  { %v2820_v62 = vpop.f32.mrb[69].mxu0 }
 0x17f   :  { %v2821_v42 = vadd.f32 %v2820_v62, %v2819_v39  ;;  %v2822_v43 = vpop.f32.mrb[70].mxu0  ;;  %v2883_v44 = vpop.f32.mrb[68].mxu1 }
 0x180   :  { %v2823_v47 = vpop.f32.mrb[71].mxu0  ;;  %v2884_v51 = vpop.f32.mrb[69].mxu1 }
 0x181   :  { %v1989_v8 = vadd.f32 %v2821_v42, %v3982_v27  ;;  %v2824_v49 = vadd.f32 %v2823_v47, %v2822_v43  ;;  %v2885_v53 = vadd.f32 %v2884_v51, %v2883_v44  ;;  %v2886_v10 = vpop.f32.mrb[70].mxu1 }
 0x182   :  { %v2887_v55 = vpop.f32.mrb[71].mxu1 }
 0x183   :  { %v1992_v12 = vadd.f32 %v2824_v49, %v3984_v31  ;;  %v2888_v58 = vadd.f32 %v2887_v55, %v2886_v10  ;;  %v4031_v59 = vadd.f32 %v2885_v53, %v1989_v8 }
 0x185   :  { %v2825_v16 = vpop.f32.mrb[72].mxu0  ;;  %v4033_v60 = vadd.f32 %v2888_v58, %v1992_v12 }
 0x186   :  { %v2826_v13 = vpop.f32.mrb[73].mxu0 }
 0x187   :  { %v2827_v63 = vadd.f32 %v2826_v13, %v2825_v16  ;;  %v2828_v0 = vpop.f32.mrb[74].mxu0  ;;  %v2889_v2 = vpop.f32.mrb[72].mxu1 }
 0x188   :  { %v2829_v4 = vpop.f32.mrb[75].mxu0  ;;  %v2890_v7 = vpop.f32.mrb[73].mxu1 }
 0x189   :  { %v1997_v27 = vadd.f32 %v2827_v63, %v3988_v46  ;;  %v2830_v5 = vadd.f32 %v2829_v4, %v2828_v0  ;;  %v2891_v9 = vadd.f32 %v2890_v7, %v2889_v2  ;;  %v2892_v30 = vpop.f32.mrb[74].mxu1 }
 0x18a   :  { %v2893_v11 = vpop.f32.mrb[75].mxu1 }
 0x18b   :  { %v2000_v31 = vadd.f32 %v2830_v5, %v3990_v50  ;;  %v2894_v14 = vadd.f32 %v2893_v11, %v2892_v30  ;;  %v4037_v15 = vadd.f32 %v2891_v9, %v1997_v27 }
 0x18d   :  { %v2831_v34 = vpop.f32.mrb[76].mxu0  ;;  %v4039_v17 = vadd.f32 %v2894_v14, %v2000_v31 }
 0x18e   :  { %v2832_v33 = vpop.f32.mrb[77].mxu0 }
 0x18f   :  { %v2833_v20 = vadd.f32 %v2832_v33, %v2831_v34  ;;  %v2834_v21 = vpop.f32.mrb[78].mxu0  ;;  %v2895_v22 = vpop.f32.mrb[76].mxu1 }
 0x190   :  { %v2835_v48 = vpop.f32.mrb[79].mxu0  ;;  %v2896_v26 = vpop.f32.mrb[77].mxu1 }
 0x191   :  { %v2005_v46 = vadd.f32 %v2833_v20, %v3994_v3  ;;  %v2836_v24 = vadd.f32 %v2835_v48, %v2834_v21  ;;  %v2897_v28 = vadd.f32 %v2896_v26, %v2895_v22  ;;  %v2898_v52 = vpop.f32.mrb[78].mxu1 }
 0x192   :  { %v2899_v29 = vpop.f32.mrb[79].mxu1 }
 0x193   :  { %v2008_v50 = vadd.f32 %v2836_v24, %v3996_v6  ;;  %v2900_v54 = vadd.f32 %v2899_v29, %v2898_v52  ;;  %v4043_v32 = vadd.f32 %v2897_v28, %v2005_v46 }
 0x195   :  { %v2837_v35 = vpop.f32.mrb[80].mxu0  ;;  %v4045_v36 = vadd.f32 %v2900_v54, %v2008_v50 }
 0x196   :  { %v2838_v56 = vpop.f32.mrb[81].mxu0 }
 0x197   :  { %v2839_v38 = vadd.f32 %v2838_v56, %v2837_v35  ;;  %v2840_v39 = vpop.f32.mrb[82].mxu0  ;;  %v2901_v62 = vpop.f32.mrb[80].mxu1 }
 0x198   :  { %v2841_v42 = vpop.f32.mrb[83].mxu0  ;;  %v2902_v44 = vpop.f32.mrb[81].mxu1 }
 0x199   :  { %v2013_v3 = vadd.f32 %v2839_v38, %v4000_v23  ;;  %v2842_v43 = vadd.f32 %v2841_v42, %v2840_v39  ;;  %v2903_v47 = vadd.f32 %v2902_v44, %v2901_v62  ;;  %v2904_v8 = vpop.f32.mrb[82].mxu1 }
 0x19a   :  { %v2905_v49 = vpop.f32.mrb[83].mxu1 }
 0x19b   :  { %v2016_v6 = vadd.f32 %v2842_v43, %v4003_v25  ;;  %v2906_v51 = vadd.f32 %v2905_v49, %v2904_v8  ;;  %v4049_v53 = vadd.f32 %v2903_v47, %v2013_v3 }
 0x19d   :  { %v2843_v10 = vpop.f32.mrb[84].mxu0  ;;  %v4051_v55 = vadd.f32 %v2906_v51, %v2016_v6 }
 0x19e   :  { %v2844_v12 = vpop.f32.mrb[85].mxu0 }
 0x19f   :  { %v2845_v58 = vadd.f32 %v2844_v12, %v2843_v10  ;;  %v2846_v16 = vpop.f32.mrb[86].mxu0  ;;  %v2907_v13 = vpop.f32.mrb[84].mxu1 }
 0x1a0   :  { %v2847_v63 = vpop.f32.mrb[87].mxu0  ;;  %v2908_v2 = vpop.f32.mrb[85].mxu1 }
 0x1a1   :  { %v2021_v23 = vadd.f32 %v2845_v58, %v4007_v41  ;;  %v2848_v0 = vadd.f32 %v2847_v63, %v2846_v16  ;;  %v2909_v4 = vadd.f32 %v2908_v2, %v2907_v13  ;;  %v2910_v27 = vpop.f32.mrb[86].mxu1 }
 0x1a2   :  { %v2911_v5 = vpop.f32.mrb[87].mxu1 }
 0x1a3   :  { %v2024_v25 = vadd.f32 %v2848_v0, %v4009_v1  ;;  %v2912_v7 = vadd.f32 %v2911_v5, %v2910_v27  ;;  %v4055_v9 = vadd.f32 %v2909_v4, %v2021_v23 }
 0x1a5   :  { %v2849_v30 = vpop.f32.mrb[88].mxu0  ;;  %v4057_v11 = vadd.f32 %v2912_v7, %v2024_v25 }
 0x1a6   :  { %v2850_v31 = vpop.f32.mrb[89].mxu0 }
 0x1a7   :  { %v2851_v14 = vadd.f32 %v2850_v31, %v2849_v30  ;;  %v2852_v34 = vpop.f32.mrb[90].mxu0  ;;  %v2913_v33 = vpop.f32.mrb[88].mxu1 }
 0x1a8   :  { %v2853_v20 = vpop.f32.mrb[91].mxu0  ;;  %v2914_v22 = vpop.f32.mrb[89].mxu1 }
 0x1a9   :  { %v2029_v41 = vadd.f32 %v2851_v14, %v4013_v61  ;;  %v2854_v21 = vadd.f32 %v2853_v20, %v2852_v34  ;;  %v2915_v48 = vadd.f32 %v2914_v22, %v2913_v33  ;;  %v2916_v46 = vpop.f32.mrb[90].mxu1 }
 0x1aa   :  { %v2917_v24 = vpop.f32.mrb[91].mxu1 }
 0x1ab   :  { %v2032_v1 = vadd.f32 %v2854_v21, %v4015_v19  ;;  %v2918_v26 = vadd.f32 %v2917_v24, %v2916_v46  ;;  %v4061_v28 = vadd.f32 %v2915_v48, %v2029_v41 }
 0x1ad   :  { %v2855_v52 = vpop.f32.mrb[92].mxu0  ;;  %v4063_v29 = vadd.f32 %v2918_v26, %v2032_v1 }
 0x1ae   :  { %v2856_v50 = vpop.f32.mrb[93].mxu0 }
 0x1af   :  { %v2857_v54 = vadd.f32 %v2856_v50, %v2855_v52  ;;  %v2858_v35 = vpop.f32.mrb[94].mxu0  ;;  %v2919_v56 = vpop.f32.mrb[92].mxu1 }
 0x1b0   :  { %v2859_v38 = vpop.f32.mrb[95].mxu0  ;;  %v2920_v62 = vpop.f32.mrb[93].mxu1 }
 0x1b1   :  { %v2037_v61 = vadd.f32 %v2857_v54, %v4019_v45  ;;  %v2860_v39 = vadd.f32 %v2859_v38, %v2858_v35  ;;  %v2921_v42 = vadd.f32 %v2920_v62, %v2919_v56  ;;  %v2922_v3 = vpop.f32.mrb[94].mxu1 }
 0x1b2   :  { %v2923_v43 = vpop.f32.mrb[95].mxu1 }
 0x1b3   :  { %v2040_v19 = vadd.f32 %v2860_v39, %v4021_v37  ;;  %v2924_v44 = vadd.f32 %v2923_v43, %v2922_v3  ;;  %v2134_v47 = vadd.f32 %v2921_v42, %v2037_v61 }
 0x1b5   :  { %v2950_v8 = vpop.f32.mrb[96].mxu0  ;;  %v2137_v51 = vadd.f32 %v2924_v44, %v2040_v19  ;;  %v2268_v19 = vpop.permute.xlu0 %2267 }
 0x1b6   :  { %v2183_v6 = vadd.f32 %v2950_v8, %v4031_v59  ;;  %v2174_v49 = vpop.f32.mrb[97].mxu0 }
 0x1b7   :  { %v2175_v10 = vadd.f32 %v2174_v49, %v4025_v57  ;;  %v2951_v12 = vpop.f32.mrb[98].mxu0 }
 0x1b8   :  { %v2186_v58 = vadd.f32 %v2951_v12, %v4033_v60  ;;  %v2177_v45 = vpop.f32.mrb[99].mxu0  ;;  %v2239_v13 = vmax.f32 %v2183_v6, 0.0 }
 0x1b9   :  { %v2178_v16 = vadd.f32 %v2177_v45, %v4027_v40  ;;  %v2237_v23 = vmax.f32 %v2175_v10, 0.0 }
 0x1ba   :  { %v2240_v63 = vmax.f32 %v2186_v58, 0.0 }
 0x1bb   :  { %v2238_v37 = vmax.f32 %v2178_v16, 0.0 }
 0x1bc   :  { %v2254_v0 = vpack.c.bf16 %v2240_v63, %v2239_v13 }
 0x1bd   :  { %v2253_v2 = vpack.c.bf16 %v2238_v37, %v2237_v23  ;;  %v2954_v4 = vpop.f32.mrb[100].mxu0 }
 0x1be   :  { %v2199_v27 = vadd.f32 %v2954_v4, %v4043_v32  ;;  %v2190_v59 = vpop.f32.mrb[101].mxu0 }
 0x1bf   :  { %v2191_v25 = vadd.f32 %v2190_v59, %v4037_v15  ;;  %v2955_v5 = vpop.f32.mrb[102].mxu0  ;;  %2965 = vmatpush3.bf16.msra.mxu1 %v2253_v2 }
 0x1c0   :  { %v2202_v57 = vadd.f32 %v2955_v5, %v4045_v36  ;;  %v2193_v60 = vpop.f32.mrb[103].mxu0  ;;  %2966 = vmatprep.subr.bf16.mxu1 %v3241_v18  ;;  %v2243_v7 = vmax.f32 %v2199_v27, 0.0 }
 0x1c1   :  { %v2194_v40 = vadd.f32 %v2193_v60, %v4039_v17  ;;  %v2241_v31 = vmax.f32 %v2191_v25, 0.0 }
 0x1c2   :  { %v2244_v30 = vmax.f32 %v2202_v57, 0.0 }
 0x1c3   :  { %v2242_v14 = vmax.f32 %v2194_v40, 0.0  ;;  %2967 = vmatpush3.bf16.msra.mxu1 %v2254_v0 }
 0x1c4   :  { %v2256_v34 = vpack.c.bf16 %v2244_v30, %v2243_v7  ;;  %2968 = vmatprep.subr.bf16.mxu1 %v3241_v18 }
 0x1c5   :  { %v2255_v32 = vpack.c.bf16 %v2242_v14, %v2241_v31  ;;  %v2958_v33 = vpop.f32.mrb[104].mxu0 }
 0x1c6   :  { %v2215_v15 = vadd.f32 %v2958_v33, %v4055_v9  ;;  %v2206_v20 = vpop.f32.mrb[105].mxu0 }
 0x1c7   :  { %v2207_v36 = vadd.f32 %v2206_v20, %v4049_v53  ;;  %v2959_v41 = vpop.f32.mrb[106].mxu0  ;;  %2969 = vmatpush3.bf16.msra.mxu1 %v2255_v32 }
 0x1c8   :  { %v2218_v21 = vadd.f32 %v2959_v41, %v4057_v11  ;;  %v2209_v17 = vpop.f32.mrb[107].mxu0  ;;  %2970 = vmatprep.subr.bf16.mxu1 %v3241_v18  ;;  %v2247_v48 = vmax.f32 %v2215_v15, 0.0 }
 0x1c9   :  { %v2210_v22 = vadd.f32 %v2209_v17, %v4051_v55  ;;  %v2245_v1 = vmax.f32 %v2207_v36, 0.0 }
 0x1ca   :  { %v2248_v46 = vmax.f32 %v2218_v21, 0.0 }
 0x1cb   :  { %v2246_v24 = vmax.f32 %v2210_v22, 0.0  ;;  %2971 = vmatpush3.bf16.msra.mxu1 %v2256_v34 }
 0x1cc   :  { %v2258_v26 = vpack.c.bf16 %v2248_v46, %v2247_v48  ;;  %2972 = vmatprep.subr.bf16.mxu1 %v3241_v18 }
 0x1cd   :  { %v2257_v9 = vpack.c.bf16 %v2246_v24, %v2245_v1  ;;  %v2962_v52 = vpop.f32.mrb[108].mxu0 }
 0x1ce   :  { %v2231_v53 = vadd.f32 %v2962_v52, %v2134_v47  ;;  %v2222_v50 = vpop.f32.mrb[109].mxu0  ;;  %v2273_v47 = vpop.permute.xlu1 %2272 }
 0x1cf   :  { %v2223_v54 = vadd.f32 %v2222_v50, %v4061_v28  ;;  %v2963_v11 = vpop.f32.mrb[110].mxu0  ;;  %2973 = vmatpush3.bf16.msra.mxu1 %v2257_v9  ;;  %v3239_v28 = vld [vmem:[%s4101_s3] sm:$0x1f]  }
 0x1d0   :  { %v2234_v35 = vadd.f32 %v2963_v11, %v2137_v51  ;;  %v2225_v56 = vpop.f32.mrb[111].mxu0  ;;  %2974 = vmatprep.subr.bf16.mxu1 %v3241_v18  ;;  %v2251_v38 = vmax.f32 %v2231_v53, 0.0 }
 0x1d1   :  { %v2226_v55 = vadd.f32 %v2225_v56, %v4063_v29  ;;  %v2249_v39 = vmax.f32 %v2223_v54, 0.0 }
 0x1d2   :  { %v2252_v61 = vmax.f32 %v2234_v35, 0.0 }
 0x1d3   :  { %v2250_v62 = vmax.f32 %v2226_v55, 0.0  ;;  %2975 = vmatpush3.bf16.msra.mxu1 %v2258_v26 }
 0x1d4   :  { %v2260_v42 = vpack.c.bf16 %v2252_v61, %v2251_v38  ;;  %2976 = vmatprep.subr.bf16.mxu1 %v3241_v18 }
 0x1d5   :  { %v2259_v3 = vpack.c.bf16 %v2250_v62, %v2249_v39 }
 0x1d7   :  { %2977 = vmatpush3.bf16.msra.mxu1 %v2259_v3 }
 0x1d8   :  { %2978 = vmatprep.subr.bf16.mxu1 %v3241_v18 }
 0x1db   :  { %2979 = vmatpush3.bf16.msra.mxu1 %v2260_v42 }
 0x1de   :  { %2981 = vmatmul.mubr.bf16.vlgmr.msra.gmra.mrb[96].mxu1 %v3239_v28 }
 0x2b1   :  { %v2315_v29 = vpop.f32.mrb[96].mxu1 }
 0x2b2   :  { %v2316_v43 = vadd.f32 %v2315_v29, %v2268_v19  ;;  %v2982_v44 = vpop.f32.mrb[97].mxu1 }
 0x2b3   :  { %v2318_v8 = vpop.f32.mrb[98].mxu1 }
 0x2b4   :  { %2323 = vst.msk [vmem:[%s4102_s5] sm:$0xff] %vm2322_vm2, %v2316_v43  ;;  %v2319_v6 = vadd.f32 %v2318_v8, %v2273_v47  ;;  %v2983_v18 = vpop.f32.mrb[99].mxu1 }
 0x2b6   :  { %2325 = vst.msk [vmem:[%s4102_s5 + $0x8] sm:$0x3] %vm2324_vm3, %v2319_v6 }

</bundles_post_ra>
